<compile_context>
chip_gen: v7x
topology: tpu7x:2x2x1
jax: 0.10.0
libtpu: 0.0.40
codegen_flags: <defaults>
</compile_context>

<pallas_src>
import math
from functools import partial

import jax
import jax.numpy as jnp
from jax.experimental import pallas as pl
from jax.experimental.pallas import tpu as pltpu


# ----------------------------------------------------------------------------
# helpers
# ----------------------------------------------------------------------------
def _pick_tile(dim, target, align):
    """Largest tile <= target that divides `dim` and is a multiple of `align`;
    falls back to the full dim (single block) for small / awkward sizes so the
    (8, 128) block-shape rule ("divisible or equal to the full dim") holds."""
    if dim <= target:
        return dim
    t = (target // align) * align
    while t >= align:
        if dim % t == 0:
            return t
        t -= align
    return dim


_VMEM_LIMIT = 32 * 1024 * 1024  # safe on v5e/v6e (128 MiB) and v7x (64 MiB)


# ----------------------------------------------------------------------------
# Kernel 1: tiled linear layer  (M, K) @ (K, N) + (1, N)
# ----------------------------------------------------------------------------
def _linear_kernel(x_ref, w_ref, b_ref, o_ref, acc_ref):
    k = pl.program_id(2)

    @pl.when(k == 0)
    def _init():
        acc_ref[...] = jnp.zeros(acc_ref.shape, jnp.float32)

    # bf16 operands, f32 accumulation (MXU fast path on all generations).
    acc_ref[...] += jnp.dot(
        x_ref[...].astype(jnp.bfloat16),
        w_ref[...].astype(jnp.bfloat16),
        preferred_element_type=jnp.float32,
    )

    @pl.when(k == pl.num_programs(2) - 1)
    def _finalize():
        o_ref[...] = (acc_ref[...] + b_ref[...].astype(jnp.float32)).astype(o_ref.dtype)


def linear_pallas(x2d, w, b, *, tm=256, tn=256, tk=512):
    """x2d: (M, K), w: (K, N), b: (N,) -> (M, N)."""
    M, K = x2d.shape
    assert w.shape[0] == K
    N = w.shape[1]

    tm = _pick_tile(M, tm, 8)
    tn = _pick_tile(N, tn, 128)
    tk = _pick_tile(K, tk, 128)

    b2d = b.reshape(1, N)
    grid = (M // tm, N // tn, K // tk)

    return pl.pallas_call(
        _linear_kernel,
        out_shape=jax.ShapeDtypeStruct((M, N), x2d.dtype),
        grid_spec=pltpu.PrefetchScalarGridSpec(
            num_scalar_prefetch=0,
            grid=grid,
            in_specs=[
                pl.BlockSpec((tm, tk), lambda i, j, k: (i, k)),
                pl.BlockSpec((tk, tn), lambda i, j, k: (k, j)),
                pl.BlockSpec((1, tn), lambda i, j, k: (0, j)),
            ],
            out_specs=pl.BlockSpec((tm, tn), lambda i, j, k: (i, j)),
            scratch_shapes=[pltpu.VMEM((tm, tn), jnp.float32)],
        ),
        compiler_params=pltpu.CompilerParams(
            dimension_semantics=("parallel", "parallel", "arbitrary"),
            vmem_limit_bytes=_VMEM_LIMIT,
        ),
    )(x2d, w, b2d)


# ----------------------------------------------------------------------------
# Kernel 2: flash-style causal attention, all heads per (batch, q-tile) block
# ----------------------------------------------------------------------------
def _flash_attn_kernel(q_ref, k_ref, v_ref, o_ref, m_sc, l_sc, acc_sc, *,
                       scale, n_head, head_size, tq, tk):
    qi = pl.program_id(1)
    ki = pl.program_id(2)
    n_tk = pl.num_programs(2)

    @pl.when(ki == 0)
    def _init():
        m_sc[...] = jnp.full(m_sc.shape, -1e30, jnp.float32)
        l_sc[...] = jnp.zeros(l_sc.shape, jnp.float32)
        acc_sc[...] = jnp.zeros(acc_sc.shape, jnp.float32)

    q_start = qi * tq
    k_start = ki * tk

    # Causal tile skip: a kv tile contributes iff its first key column is not
    # strictly past the last query row of this q tile (halves MXU/EUP work).
    @pl.when(k_start <= q_start + (tq - 1))
    def _compute():
        rows = q_start + jax.lax.broadcasted_iota(jnp.int32, (tq, tk), 0)
        cols = k_start + jax.lax.broadcasted_iota(jnp.int32, (tq, tk), 1)
        causal = cols <= rows  # shared across heads (hoisted out of the loop)

        for h in range(n_head):  # static unroll over heads in this block
            dsl = slice(h * head_size, (h + 1) * head_size)  # lane slab of head h
            hsl = slice(h, h + 1)

            # fold 1/sqrt(hs) into the (tq, hs) q tile, not the (tq, tk) scores
            q = (q_ref[:, dsl] * scale).astype(jnp.bfloat16)   # (tq, hs)
            kk = k_ref[:, dsl].astype(jnp.bfloat16)            # (tk, hs)
            vv = v_ref[:, dsl].astype(jnp.bfloat16)            # (tk, hs)

            # q @ k^T via dot_general contracting the last dims (no k.T relayout)
            s = jax.lax.dot_general(
                q, kk, (((1,), (1,)), ((), ())),
                preferred_element_type=jnp.float32)            # (tq, tk) f32
            s = jnp.where(causal, s, -1e30)

            m_prev = m_sc[:, hsl]                              # (tq, 1)
            m_new = jnp.maximum(m_prev, jnp.max(s, axis=-1, keepdims=True))
            alpha = jnp.exp(m_prev - m_new)
            p = jnp.exp(s - m_new)                             # f32 softmax math

            l_sc[:, hsl] = alpha * l_sc[:, hsl] + jnp.sum(p, axis=-1, keepdims=True)
            acc_sc[:, dsl] = alpha * acc_sc[:, dsl] + jnp.dot(
                p.astype(jnp.bfloat16), vv, preferred_element_type=jnp.float32)
            m_sc[:, hsl] = m_new

    @pl.when(ki == n_tk - 1)
    def _finalize():
        for h in range(n_head):
            dsl = slice(h * head_size, (h + 1) * head_size)
            hsl = slice(h, h + 1)
            acc_sc[:, dsl] = acc_sc[:, dsl] * pl.reciprocal(l_sc[:, hsl], approx=True)
        # single lane-dense (tq, d_model) store
        o_ref[...] = acc_sc[...].astype(o_ref.dtype)


def causal_attention_pallas(q, k, v, n_head, *, tq=128, tk=128):
    """q, k, v: (B, T, d_model) in 'b t (h d)' layout -> (B, T, d_model)."""
    B, T, d_model = q.shape
    head_size = d_model // n_head
    scale = 1.0 / math.sqrt(head_size)

    tq = _pick_tile(T, tq, 8)
    tk = _pick_tile(T, tk, 8)
    grid = (B, T // tq, T // tk)

    kernel = partial(_flash_attn_kernel, scale=scale, n_head=n_head,
                     head_size=head_size, tq=tq, tk=tk)

    return pl.pallas_call(
        kernel,
        out_shape=jax.ShapeDtypeStruct((B, T, d_model), q.dtype),
        grid_spec=pltpu.PrefetchScalarGridSpec(
            num_scalar_prefetch=0,
            grid=grid,
            in_specs=[
                pl.BlockSpec((None, tq, d_model), lambda b, qi, ki: (b, qi, 0)),
                pl.BlockSpec((None, tk, d_model), lambda b, qi, ki: (b, ki, 0)),
                pl.BlockSpec((None, tk, d_model), lambda b, qi, ki: (b, ki, 0)),
            ],
            out_specs=pl.BlockSpec((None, tq, d_model), lambda b, qi, ki: (b, qi, 0)),
            scratch_shapes=[
                pltpu.VMEM((tq, n_head), jnp.float32),    # running max per head
                pltpu.VMEM((tq, n_head), jnp.float32),    # running sum per head
                pltpu.VMEM((tq, d_model), jnp.float32),   # output accumulator
            ],
        ),
        compiler_params=pltpu.CompilerParams(
            dimension_semantics=("parallel", "parallel", "arbitrary"),
            vmem_limit_bytes=_VMEM_LIMIT,
        ),
    )(q, k, v)


# ----------------------------------------------------------------------------
# CSA forward (glue in plain JAX, hot paths in Pallas, no transposes/splits)
# ----------------------------------------------------------------------------
def csa_forward(x, params, n_head):
    B, T, d_model = x.shape
    x2d = x.reshape(B * T, d_model)

    # q / k / v projections (column blocks of the fused torch qkv Linear).
    q = linear_pallas(x2d, params["w_q"], params["b_q"]).reshape(B, T, d_model)
    k = linear_pallas(x2d, params["w_k"], params["b_k"]).reshape(B, T, d_model)
    v = linear_pallas(x2d, params["w_v"], params["b_v"]).reshape(B, T, d_model)

    y = causal_attention_pallas(q, k, v, n_head)        # (B, T, d_model)

    # output projection; dropout_p = 0.0 -> identity
    out = linear_pallas(y.reshape(B * T, d_model), params["w_out"], params["b_out"])
    return out.reshape(B, T, d_model)


# ----------------------------------------------------------------------------
# Parameter init: xavier_uniform with the fused-qkv fan (matches torch module),
# stored pre-split as column blocks so no per-step weight slicing is needed.
# ----------------------------------------------------------------------------
def init_params(key, d_model):
    k1, k2 = jax.random.split(key)

    def xavier(key, fan_in, fan_out):
        a = math.sqrt(6.0 / (fan_in + fan_out))
        return jax.random.uniform(key, (fan_in, fan_out), jnp.float32, -a, a)

    w_qkv = xavier(k1, d_model, 3 * d_model)   # fused fan, as in nn.Linear(d, 3d)
    return {
        "w_q": w_qkv[:, :d_model],
        "w_k": w_qkv[:, d_model:2 * d_model],
        "w_v": w_qkv[:, 2 * d_model:],
        "b_q": jnp.zeros((d_model,), jnp.float32),
        "b_k": jnp.zeros((d_model,), jnp.float32),
        "b_v": jnp.zeros((d_model,), jnp.float32),
        "w_out": xavier(k2, d_model, d_model),
        "b_out": jnp.zeros((d_model,), jnp.float32),
    }


# ----------------------------------------------------------------------------
# Pure-JAX reference (mirror of the PyTorch forward) for validation
# ----------------------------------------------------------------------------
def csa_reference(x, params, n_head):
    B, T, dm = x.shape
    hs = dm // n_head
    q = x @ params["w_q"] + params["b_q"]
    k = x @ params["w_k"] + params["b_k"]
    v = x @ params["w_v"] + params["b_v"]

    def heads(a):
        return a.reshape(B, T, n_head, hs).transpose(0, 2, 1, 3)

    q, k, v = heads(q), heads(k), heads(v)
    s = jnp.einsum("bhqd,bhkd->bhqk", q, k) / math.sqrt(hs)
    mask = jnp.tril(jnp.ones((T, T), dtype=bool))
    s = jnp.where(mask, s, -jnp.inf)
    p = jax.nn.softmax(s, axis=-1)
    y = jnp.einsum("bhqk,bhkd->bhqd", p, v)
    y = y.transpose(0, 2, 1, 3).reshape(B, T, dm)
    return y @ params["w_out"] + params["b_out"]


if __name__ == "__main__":
    B, T, d_model, n_head = 2, 8, 32, 4

    key = jax.random.PRNGKey(0)
    kx, kp = jax.random.split(key)
    x = jax.random.normal(kx, (B, T, d_model), jnp.float32)
    params = init_params(kp, d_model)

    fwd = jax.jit(partial(csa_forward, n_head=n_head))
    out = fwd(x, params)
    jax.block_until_ready(out)

    assert out.shape == (B, T, d_model)
    assert bool(jnp.isfinite(out).all())

    # loose tolerance: kernels use bf16 MXU operands + approx reciprocal
    ref = csa_reference(x, params, n_head)
    max_err = float(jnp.max(jnp.abs(out - ref)))
    assert max_err < 1e-1, f"mismatch vs reference: max abs err {max_err}"

    print("KERNEL_OK")
</pallas_src>

<mosaic_0001>
module attributes {stable_mosaic.version = 11 : i64} {
  func.func @_linear_kernel(%arg0: i32, %arg1: i32, %arg2: i32, %arg3: memref<16x32xf32, #tpu.memory_space<vmem>>, %arg4: memref<32x32xf32, #tpu.memory_space<vmem>>, %arg5: memref<1x32xf32, #tpu.memory_space<vmem>>, %arg6: memref<16x32xf32, #tpu.memory_space<vmem>>, %arg7: memref<16x32xf32, #tpu.memory_space<vmem>>) attributes {dimension_semantics = [#tpu.dimension_semantics<parallel>, #tpu.dimension_semantics<parallel>, #tpu.dimension_semantics<arbitrary>], iteration_bounds = array<i64: 1, 1, 1>, scalar_prefetch = 0 : i64, scratch_operands = 1 : i64, tpu.core_type = #tpu.core_type<tc>, window_params = [{transform_indices = @transform_0, window_bounds = array<i64: 16, 32>}, {transform_indices = @transform_1, window_bounds = array<i64: 32, 32>}, {transform_indices = @transform_2, window_bounds = array<i64: 1, 32>}, {transform_indices = @transform_3, window_bounds = array<i64: 16, 32>}]} {
    %c0_i32 = arith.constant 0 : i32
    %0 = arith.cmpi eq, %arg2, %c0_i32 : i32
    %1 = arith.extui %0 : i1 to i32
    %c0_i32_0 = arith.constant 0 : i32
    %2 = arith.cmpi ne, %1, %c0_i32_0 : i32
    scf.if %2 {
      %cst_10 = arith.constant 0.000000e+00 : f32
      %14 = vector.broadcast %cst_10 : f32 to vector<16x32xf32>
      %c0_11 = arith.constant 0 : index
      %c0_12 = arith.constant 0 : index
      %15 = vector.load %arg7[%c0_11, %c0_12] : memref<16x32xf32, #tpu.memory_space<vmem>>, vector<16x32xf32>
      tpu.vector_store %arg7[%c0_11, %c0_12], %14 {strides = array<i32>} : memref<16x32xf32, #tpu.memory_space<vmem>>, vector<16x32xf32>,
    } else {
    }
    %c0 = arith.constant 0 : index
    %c0_1 = arith.constant 0 : index
    %3 = vector.load %arg7[%c0, %c0_1] : memref<16x32xf32, #tpu.memory_space<vmem>>, vector<16x32xf32>
    %c0_2 = arith.constant 0 : index
    %c0_3 = arith.constant 0 : index
    %4 = vector.load %arg3[%c0_2, %c0_3] : memref<16x32xf32, #tpu.memory_space<vmem>>, vector<16x32xf32>
    %5 = arith.truncf %4 : vector<16x32xf32> to vector<16x32xbf16>
    %c0_4 = arith.constant 0 : index
    %c0_5 = arith.constant 0 : index
    %6 = vector.load %arg4[%c0_4, %c0_5] : memref<32x32xf32, #tpu.memory_space<vmem>>, vector<32x32xf32>
    %7 = arith.truncf %6 : vector<32x32xf32> to vector<32x32xbf16>
    %cst = arith.constant dense<0.000000e+00> : vector<16x32xf32>
    %8 = tpu.matmul %5, %7, %cst {dimension_numbers = #tpu.dot_dimension_numbers<[1], [0], [0], [1], [0, 0, 1, 1], [], []>} : vector<16x32xbf16>, vector<32x32xbf16>, vector<16x32xf32> -> vector<16x32xf32>
    %9 = arith.addf %3, %8 : vector<16x32xf32>
    %c0_6 = arith.constant 0 : index
    %c0_7 = arith.constant 0 : index
    %10 = vector.load %arg7[%c0_6, %c0_7] : memref<16x32xf32, #tpu.memory_space<vmem>>, vector<16x32xf32>
    tpu.vector_store %arg7[%c0_6, %c0_7], %9 {strides = array<i32>} : memref<16x32xf32, #tpu.memory_space<vmem>>, vector<16x32xf32>,
    %c0_i32_8 = arith.constant 0 : i32
    %11 = arith.cmpi eq, %arg2, %c0_i32_8 : i32
    %12 = arith.extui %11 : i1 to i32
    %c0_i32_9 = arith.constant 0 : i32
    %13 = arith.cmpi ne, %12, %c0_i32_9 : i32
    scf.if %13 {
      %c0_10 = arith.constant 0 : index
      %c0_11 = arith.constant 0 : index
      %14 = vector.load %arg7[%c0_10, %c0_11] : memref<16x32xf32, #tpu.memory_space<vmem>>, vector<16x32xf32>
      %c0_12 = arith.constant 0 : index
      %c0_13 = arith.constant 0 : index
      %15 = vector.load %arg5[%c0_12, %c0_13] : memref<1x32xf32, #tpu.memory_space<vmem>>, vector<1x32xf32>
      %16 = vector.broadcast %15 : vector<1x32xf32> to vector<16x32xf32>
      %17 = arith.addf %14, %16 : vector<16x32xf32>
      %c0_14 = arith.constant 0 : index
      %c0_15 = arith.constant 0 : index
      %18 = vector.load %arg6[%c0_14, %c0_15] : memref<16x32xf32, #tpu.memory_space<vmem>>, vector<16x32xf32>
      tpu.vector_store %arg6[%c0_14, %c0_15], %17 {strides = array<i32>} : memref<16x32xf32, #tpu.memory_space<vmem>>, vector<16x32xf32>,
    } else {
    }
    return
  }
  func.func @transform_0(%arg0: i32, %arg1: i32, %arg2: i32) -> (i32, i32) {
    %c0_i32 = arith.constant 0 : i32
    return %arg0, %arg2 : i32, i32
  }
  func.func @transform_1(%arg0: i32, %arg1: i32, %arg2: i32) -> (i32, i32) {
    %c0_i32 = arith.constant 0 : i32
    return %arg2, %arg1 : i32, i32
  }
  func.func @transform_2(%arg0: i32, %arg1: i32, %arg2: i32) -> (i32, i32) {
    %c0_i32 = arith.constant 0 : i32
    %c0_i32_0 = arith.constant 0 : i32
    return %c0_i32, %arg1 : i32, i32
  }
  func.func @transform_3(%arg0: i32, %arg1: i32, %arg2: i32) -> (i32, i32) {
    %c0_i32 = arith.constant 0 : i32
    return %arg0, %arg1 : i32, i32
  }
}

module attributes {stable_mosaic.version = 11 : i64} {
  func.func @_linear_kernel(%arg0: i32, %arg1: i32, %arg2: i32, %arg3: memref<16x32xf32, #tpu.memory_space<vmem>>, %arg4: memref<32x32xf32, #tpu.memory_space<vmem>>, %arg5: memref<1x32xf32, #tpu.memory_space<vmem>>, %arg6: memref<16x32xf32, #tpu.memory_space<vmem>>, %arg7: memref<16x32xf32, #tpu.memory_space<vmem>>) attributes {dimension_semantics = [#tpu.dimension_semantics<parallel>, #tpu.dimension_semantics<parallel>, #tpu.dimension_semantics<arbitrary>], iteration_bounds = array<i64: 1, 1, 1>, scalar_prefetch = 0 : i64, scratch_operands = 1 : i64, tpu.core_type = #tpu.core_type<tc>, window_params = [{transform_indices = @transform_0, window_bounds = array<i64: 16, 32>}, {transform_indices = @transform_1, window_bounds = array<i64: 32, 32>}, {transform_indices = @transform_2, window_bounds = array<i64: 1, 32>}, {transform_indices = @transform_3, window_bounds = array<i64: 16, 32>}]} {
    %c0_i32 = arith.constant 0 : i32
    %0 = arith.cmpi eq, %arg2, %c0_i32 : i32
    %1 = arith.extui %0 : i1 to i32
    %c0_i32_0 = arith.constant 0 : i32
    %2 = arith.cmpi ne, %1, %c0_i32_0 : i32
    scf.if %2 {
      %cst_10 = arith.constant 0.000000e+00 : f32
      %14 = vector.broadcast %cst_10 : f32 to vector<16x32xf32>
      %c0_11 = arith.constant 0 : index
      %c0_12 = arith.constant 0 : index
      %15 = vector.load %arg7[%c0_11, %c0_12] : memref<16x32xf32, #tpu.memory_space<vmem>>, vector<16x32xf32>
      tpu.vector_store %arg7[%c0_11, %c0_12], %14 {strides = array<i32>} : memref<16x32xf32, #tpu.memory_space<vmem>>, vector<16x32xf32>,
    } else {
    }
    %c0 = arith.constant 0 : index
    %c0_1 = arith.constant 0 : index
    %3 = vector.load %arg7[%c0, %c0_1] : memref<16x32xf32, #tpu.memory_space<vmem>>, vector<16x32xf32>
    %c0_2 = arith.constant 0 : index
    %c0_3 = arith.constant 0 : index
    %4 = vector.load %arg3[%c0_2, %c0_3] : memref<16x32xf32, #tpu.memory_space<vmem>>, vector<16x32xf32>
    %5 = arith.truncf %4 : vector<16x32xf32> to vector<16x32xbf16>
    %c0_4 = arith.constant 0 : index
    %c0_5 = arith.constant 0 : index
    %6 = vector.load %arg4[%c0_4, %c0_5] : memref<32x32xf32, #tpu.memory_space<vmem>>, vector<32x32xf32>
    %7 = arith.truncf %6 : vector<32x32xf32> to vector<32x32xbf16>
    %cst = arith.constant dense<0.000000e+00> : vector<16x32xf32>
    %8 = tpu.matmul %5, %7, %cst {dimension_numbers = #tpu.dot_dimension_numbers<[1], [0], [0], [1], [0, 0, 1, 1], [], []>} : vector<16x32xbf16>, vector<32x32xbf16>, vector<16x32xf32> -> vector<16x32xf32>
    %9 = arith.addf %3, %8 : vector<16x32xf32>
    %c0_6 = arith.constant 0 : index
    %c0_7 = arith.constant 0 : index
    %10 = vector.load %arg7[%c0_6, %c0_7] : memref<16x32xf32, #tpu.memory_space<vmem>>, vector<16x32xf32>
    tpu.vector_store %arg7[%c0_6, %c0_7], %9 {strides = array<i32>} : memref<16x32xf32, #tpu.memory_space<vmem>>, vector<16x32xf32>,
    %c0_i32_8 = arith.constant 0 : i32
    %11 = arith.cmpi eq, %arg2, %c0_i32_8 : i32
    %12 = arith.extui %11 : i1 to i32
    %c0_i32_9 = arith.constant 0 : i32
    %13 = arith.cmpi ne, %12, %c0_i32_9 : i32
    scf.if %13 {
      %c0_10 = arith.constant 0 : index
      %c0_11 = arith.constant 0 : index
      %14 = vector.load %arg7[%c0_10, %c0_11] : memref<16x32xf32, #tpu.memory_space<vmem>>, vector<16x32xf32>
      %c0_12 = arith.constant 0 : index
      %c0_13 = arith.constant 0 : index
      %15 = vector.load %arg5[%c0_12, %c0_13] : memref<1x32xf32, #tpu.memory_space<vmem>>, vector<1x32xf32>
      %16 = vector.broadcast %15 : vector<1x32xf32> to vector<16x32xf32>
      %17 = arith.addf %14, %16 : vector<16x32xf32>
      %c0_14 = arith.constant 0 : index
      %c0_15 = arith.constant 0 : index
      %18 = vector.load %arg6[%c0_14, %c0_15] : memref<16x32xf32, #tpu.memory_space<vmem>>, vector<16x32xf32>
      tpu.vector_store %arg6[%c0_14, %c0_15], %17 {strides = array<i32>} : memref<16x32xf32, #tpu.memory_space<vmem>>, vector<16x32xf32>,
    } else {
    }
    return
  }
  func.func @transform_0(%arg0: i32, %arg1: i32, %arg2: i32) -> (i32, i32) {
    %c0_i32 = arith.constant 0 : i32
    return %arg0, %arg2 : i32, i32
  }
  func.func @transform_1(%arg0: i32, %arg1: i32, %arg2: i32) -> (i32, i32) {
    %c0_i32 = arith.constant 0 : i32
    return %arg2, %arg1 : i32, i32
  }
  func.func @transform_2(%arg0: i32, %arg1: i32, %arg2: i32) -> (i32, i32) {
    %c0_i32 = arith.constant 0 : i32
    %c0_i32_0 = arith.constant 0 : i32
    return %c0_i32, %arg1 : i32, i32
  }
  func.func @transform_3(%arg0: i32, %arg1: i32, %arg2: i32) -> (i32, i32) {
    %c0_i32 = arith.constant 0 : i32
    return %arg0, %arg1 : i32, i32
  }
}

module attributes {stable_mosaic.version = 11 : i64} {
  func.func @_flash_attn_kernel(%arg0: i32, %arg1: i32, %arg2: i32, %arg3: memref<1x8x32xf32, #tpu.memory_space<vmem>>, %arg4: memref<1x8x32xf32, #tpu.memory_space<vmem>>, %arg5: memref<1x8x32xf32, #tpu.memory_space<vmem>>, %arg6: memref<1x8x32xf32, #tpu.memory_space<vmem>>, %arg7: memref<8x4xf32, #tpu.memory_space<vmem>>, %arg8: memref<8x4xf32, #tpu.memory_space<vmem>>, %arg9: memref<8x32xf32, #tpu.memory_space<vmem>>) attributes {dimension_semantics = [#tpu.dimension_semantics<parallel>, #tpu.dimension_semantics<parallel>, #tpu.dimension_semantics<arbitrary>], iteration_bounds = array<i64: 2, 1, 1>, scalar_prefetch = 0 : i64, scratch_operands = 3 : i64, tpu.core_type = #tpu.core_type<tc>, window_params = [{transform_indices = @transform_0, window_bounds = array<i64: 1, 8, 32>}, {transform_indices = @transform_1, window_bounds = array<i64: 1, 8, 32>}, {transform_indices = @transform_2, window_bounds = array<i64: 1, 8, 32>}, {transform_indices = @transform_3, window_bounds = array<i64: 1, 8, 32>}]} {
    %c0_i32 = arith.constant 0 : i32
    %0 = arith.cmpi eq, %arg2, %c0_i32 : i32
    %1 = arith.extui %0 : i1 to i32
    %c0_i32_0 = arith.constant 0 : i32
    %2 = arith.cmpi ne, %1, %c0_i32_0 : i32
    scf.if %2 {
      %cst = arith.constant -1.000000e+30 : f32
      %12 = vector.broadcast %cst : f32 to vector<8x4xf32>
      %c0 = arith.constant 0 : index
      %c0_5 = arith.constant 0 : index
      %13 = vector.load %arg7[%c0, %c0_5] : memref<8x4xf32, #tpu.memory_space<vmem>>, vector<8x4xf32>
      tpu.vector_store %arg7[%c0, %c0_5], %12 {strides = array<i32>} : memref<8x4xf32, #tpu.memory_space<vmem>>, vector<8x4xf32>,
      %cst_6 = arith.constant 0.000000e+00 : f32
      %14 = vector.broadcast %cst_6 : f32 to vector<8x4xf32>
      %c0_7 = arith.constant 0 : index
      %c0_8 = arith.constant 0 : index
      %15 = vector.load %arg8[%c0_7, %c0_8] : memref<8x4xf32, #tpu.memory_space<vmem>>, vector<8x4xf32>
      tpu.vector_store %arg8[%c0_7, %c0_8], %14 {strides = array<i32>} : memref<8x4xf32, #tpu.memory_space<vmem>>, vector<8x4xf32>,
      %cst_9 = arith.constant 0.000000e+00 : f32
      %16 = vector.broadcast %cst_9 : f32 to vector<8x32xf32>
      %c0_10 = arith.constant 0 : index
      %c0_11 = arith.constant 0 : index
      %17 = vector.load %arg9[%c0_10, %c0_11] : memref<8x32xf32, #tpu.memory_space<vmem>>, vector<8x32xf32>
      tpu.vector_store %arg9[%c0_10, %c0_11], %16 {strides = array<i32>} : memref<8x32xf32, #tpu.memory_space<vmem>>, vector<8x32xf32>,
    } else {
    }
    %c8_i32 = arith.constant 8 : i32
    %3 = arith.muli %arg1, %c8_i32 : i32
    %c8_i32_1 = arith.constant 8 : i32
    %4 = arith.muli %arg2, %c8_i32_1 : i32
    %c7_i32 = arith.constant 7 : i32
    %5 = arith.addi %3, %c7_i32 : i32
    %6 = arith.cmpi sle, %4, %5 : i32
    %7 = arith.extui %6 : i1 to i32
    %c0_i32_2 = arith.constant 0 : i32
    %8 = arith.cmpi ne, %7, %c0_i32_2 : i32
    scf.if %8 {
      %12 = tpu.iota {dimensions = array<i32: 0>} : vector<8x8xi32>
      %13 = vector.broadcast %3 : i32 to vector<8x8xi32>
      %14 = arith.addi %13, %12 : vector<8x8xi32>
      %15 = tpu.iota {dimensions = array<i32: 1>} : vector<8x8xi32>
      %16 = vector.broadcast %4 : i32 to vector<8x8xi32>
      %17 = arith.addi %16, %15 : vector<8x8xi32>
      %18 = arith.cmpi sle, %17, %14 : vector<8x8xi32>
      %c0 = arith.constant 0 : index
      %c0_5 = arith.constant 0 : index
      %c0_6 = arith.constant 0 : index
      %19 = vector.load %arg3[%c0, %c0_5, %c0_6] : memref<1x8x32xf32, #tpu.memory_space<vmem>>, vector<1x8x8xf32>
      %20 = vector.shape_cast %19 : vector<1x8x8xf32> to vector<8x8xf32>
      %cst = arith.constant 0.353553385 : f32
      %21 = vector.broadcast %cst : f32 to vector<8x8xf32>
      %22 = arith.mulf %20, %21 : vector<8x8xf32>
      %23 = arith.truncf %22 : vector<8x8xf32> to vector<8x8xbf16>
      %c0_7 = arith.constant 0 : index
      %c0_8 = arith.constant 0 : index
      %c0_9 = arith.constant 0 : index
      %24 = vector.load %arg4[%c0_7, %c0_8, %c0_9] : memref<1x8x32xf32, #tpu.memory_space<vmem>>, vector<1x8x8xf32>
      %25 = vector.shape_cast %24 : vector<1x8x8xf32> to vector<8x8xf32>
      %26 = arith.truncf %25 : vector<8x8xf32> to vector<8x8xbf16>
      %c0_10 = arith.constant 0 : index
      %c0_11 = arith.constant 0 : index
      %c0_12 = arith.constant 0 : index
      %27 = vector.load %arg5[%c0_10, %c0_11, %c0_12] : memref<1x8x32xf32, #tpu.memory_space<vmem>>, vector<1x8x8xf32>
      %28 = vector.shape_cast %27 : vector<1x8x8xf32> to vector<8x8xf32>
      %29 = arith.truncf %28 : vector<8x8xf32> to vector<8x8xbf16>
      %cst_13 = arith.constant dense<0.000000e+00> : vector<8x8xf32>
      %30 = tpu.matmul %23, %26, %cst_13 {dimension_numbers = #tpu.dot_dimension_numbers<[1], [1], [0], [0], [0, 0, 1, 0], [], []>} : vector<8x8xbf16>, vector<8x8xbf16>, vector<8x8xf32> -> vector<8x8xf32>
      %cst_14 = arith.constant -1.000000e+30 : f32
      %31 = vector.broadcast %cst_14 : f32 to vector<8x8xf32>
      %32 = arith.select %18, %30, %31 : vector<8x8xi1>, vector<8x8xf32>
      %c0_15 = arith.constant 0 : index
      %c0_16 = arith.constant 0 : index
      %33 = vector.load %arg7[%c0_15, %c0_16] : memref<8x4xf32, #tpu.memory_space<vmem>>, vector<8x1xf32>
      %cst_17 = arith.constant dense<0xFF800000> : vector<8xf32>
      %34 = vector.multi_reduction <maximumf>, %32, %cst_17 [1] : vector<8x8xf32> to vector<8xf32>
      %35 = vector.shape_cast %34 : vector<8xf32> to vector<8x1xf32>
      %36 = arith.maximumf %33, %35 : vector<8x1xf32>
      %37 = arith.subf %33, %36 : vector<8x1xf32>
      %38 = math.exp %37 : vector<8x1xf32>
      %39 = vector.broadcast %36 : vector<8x1xf32> to vector<8x8xf32>
      %40 = arith.subf %32, %39 : vector<8x8xf32>
      %41 = math.exp %40 : vector<8x8xf32>
      %c0_18 = arith.constant 0 : index
      %c0_19 = arith.constant 0 : index
      %42 = vector.load %arg8[%c0_18, %c0_19] : memref<8x4xf32, #tpu.memory_space<vmem>>, vector<8x1xf32>
      %43 = arith.mulf %38, %42 : vector<8x1xf32>
      %cst_20 = arith.constant dense<0.000000e+00> : vector<8xf32>
      %44 = vector.multi_reduction <add>, %41, %cst_20 [1] : vector<8x8xf32> to vector<8xf32>
      %45 = vector.shape_cast %44 : vector<8xf32> to vector<8x1xf32>
      %46 = arith.addf %43, %45 : vector<8x1xf32>
      %c0_21 = arith.constant 0 : index
      %c0_22 = arith.constant 0 : index
      %47 = vector.load %arg8[%c0_21, %c0_22] : memref<8x4xf32, #tpu.memory_space<vmem>>, vector<8x1xf32>
      tpu.vector_store %arg8[%c0_21, %c0_22], %46 {strides = array<i32>} : memref<8x4xf32, #tpu.memory_space<vmem>>, vector<8x1xf32>,
      %c0_23 = arith.constant 0 : index
      %c0_24 = arith.constant 0 : index
      %48 = vector.load %arg9[%c0_23, %c0_24] : memref<8x32xf32, #tpu.memory_space<vmem>>, vector<8x8xf32>
      %49 = vector.broadcast %38 : vector<8x1xf32> to vector<8x8xf32>
      %50 = arith.mulf %49, %48 : vector<8x8xf32>
      %51 = arith.truncf %41 : vector<8x8xf32> to vector<8x8xbf16>
      %cst_25 = arith.constant dense<0.000000e+00> : vector<8x8xf32>
      %52 = tpu.matmul %51, %29, %cst_25 {dimension_numbers = #tpu.dot_dimension_numbers<[1], [0], [0], [1], [0, 0, 1, 1], [], []>} : vector<8x8xbf16>, vector<8x8xbf16>, vector<8x8xf32> -> vector<8x8xf32>
      %53 = arith.addf %50, %52 : vector<8x8xf32>
      %c0_26 = arith.constant 0 : index
      %c0_27 = arith.constant 0 : index
      %54 = vector.load %arg9[%c0_26, %c0_27] : memref<8x32xf32, #tpu.memory_space<vmem>>, vector<8x8xf32>
      tpu.vector_store %arg9[%c0_26, %c0_27], %53 {strides = array<i32>} : memref<8x32xf32, #tpu.memory_space<vmem>>, vector<8x8xf32>,
      %c0_28 = arith.constant 0 : index
      %c0_29 = arith.constant 0 : index
      %55 = vector.load %arg7[%c0_28, %c0_29] : memref<8x4xf32, #tpu.memory_space<vmem>>, vector<8x1xf32>
      tpu.vector_store %arg7[%c0_28, %c0_29], %36 {strides = array<i32>} : memref<8x4xf32, #tpu.memory_space<vmem>>, vector<8x1xf32>,
      %c0_30 = arith.constant 0 : index
      %c0_31 = arith.constant 0 : index
      %c8 = arith.constant 8 : index
      %56 = vector.load %arg3[%c0_30, %c0_31, %c8] : memref<1x8x32xf32, #tpu.memory_space<vmem>>, vector<1x8x8xf32>
      %57 = vector.shape_cast %56 : vector<1x8x8xf32> to vector<8x8xf32>
      %cst_32 = arith.constant 0.353553385 : f32
      %58 = vector.broadcast %cst_32 : f32 to vector<8x8xf32>
      %59 = arith.mulf %57, %58 : vector<8x8xf32>
      %60 = arith.truncf %59 : vector<8x8xf32> to vector<8x8xbf16>
      %c0_33 = arith.constant 0 : index
      %c0_34 = arith.constant 0 : index
      %c8_35 = arith.constant 8 : index
      %61 = vector.load %arg4[%c0_33, %c0_34, %c8_35] : memref<1x8x32xf32, #tpu.memory_space<vmem>>, vector<1x8x8xf32>
      %62 = vector.shape_cast %61 : vector<1x8x8xf32> to vector<8x8xf32>
      %63 = arith.truncf %62 : vector<8x8xf32> to vector<8x8xbf16>
      %c0_36 = arith.constant 0 : index
      %c0_37 = arith.constant 0 : index
      %c8_38 = arith.constant 8 : index
      %64 = vector.load %arg5[%c0_36, %c0_37, %c8_38] : memref<1x8x32xf32, #tpu.memory_space<vmem>>, vector<1x8x8xf32>
      %65 = vector.shape_cast %64 : vector<1x8x8xf32> to vector<8x8xf32>
      %66 = arith.truncf %65 : vector<8x8xf32> to vector<8x8xbf16>
      %cst_39 = arith.constant dense<0.000000e+00> : vector<8x8xf32>
      %67 = tpu.matmul %60, %63, %cst_39 {dimension_numbers = #tpu.dot_dimension_numbers<[1], [1], [0], [0], [0, 0, 1, 0], [], []>} : vector<8x8xbf16>, vector<8x8xbf16>, vector<8x8xf32> -> vector<8x8xf32>
      %cst_40 = arith.constant -1.000000e+30 : f32
      %68 = vector.broadcast %cst_40 : f32 to vector<8x8xf32>
      %69 = arith.select %18, %67, %68 : vector<8x8xi1>, vector<8x8xf32>
      %c0_41 = arith.constant 0 : index
      %c1 = arith.constant 1 : index
      %70 = vector.load %arg7[%c0_41, %c1] : memref<8x4xf32, #tpu.memory_space<vmem>>, vector<8x1xf32>
      %cst_42 = arith.constant dense<0xFF800000> : vector<8xf32>
      %71 = vector.multi_reduction <maximumf>, %69, %cst_42 [1] : vector<8x8xf32> to vector<8xf32>
      %72 = vector.shape_cast %71 : vector<8xf32> to vector<8x1xf32>
      %73 = arith.maximumf %70, %72 : vector<8x1xf32>
      %74 = arith.subf %70, %73 : vector<8x1xf32>
      %75 = math.exp %74 : vector<8x1xf32>
      %76 = vector.broadcast %73 : vector<8x1xf32> to vector<8x8xf32>
      %77 = arith.subf %69, %76 : vector<8x8xf32>
      %78 = math.exp %77 : vector<8x8xf32>
      %c0_43 = arith.constant 0 : index
      %c1_44 = arith.constant 1 : index
      %79 = vector.load %arg8[%c0_43, %c1_44] : memref<8x4xf32, #tpu.memory_space<vmem>>, vector<8x1xf32>
      %80 = arith.mulf %75, %79 : vector<8x1xf32>
      %cst_45 = arith.constant dense<0.000000e+00> : vector<8xf32>
      %81 = vector.multi_reduction <add>, %78, %cst_45 [1] : vector<8x8xf32> to vector<8xf32>
      %82 = vector.shape_cast %81 : vector<8xf32> to vector<8x1xf32>
      %83 = arith.addf %80, %82 : vector<8x1xf32>
      %c0_46 = arith.constant 0 : index
      %c1_47 = arith.constant 1 : index
      %84 = vector.load %arg8[%c0_46, %c1_47] : memref<8x4xf32, #tpu.memory_space<vmem>>, vector<8x1xf32>
      tpu.vector_store %arg8[%c0_46, %c1_47], %83 {strides = array<i32>} : memref<8x4xf32, #tpu.memory_space<vmem>>, vector<8x1xf32>,
      %c0_48 = arith.constant 0 : index
      %c8_49 = arith.constant 8 : index
      %85 = vector.load %arg9[%c0_48, %c8_49] : memref<8x32xf32, #tpu.memory_space<vmem>>, vector<8x8xf32>
      %86 = vector.broadcast %75 : vector<8x1xf32> to vector<8x8xf32>
      %87 = arith.mulf %86, %85 : vector<8x8xf32>
      %88 = arith.truncf %78 : vector<8x8xf32> to vector<8x8xbf16>
      %cst_50 = arith.constant dense<0.000000e+00> : vector<8x8xf32>
      %89 = tpu.matmul %88, %66, %cst_50 {dimension_numbers = #tpu.dot_dimension_numbers<[1], [0], [0], [1], [0, 0, 1, 1], [], []>} : vector<8x8xbf16>, vector<8x8xbf16>, vector<8x8xf32> -> vector<8x8xf32>
      %90 = arith.addf %87, %89 : vector<8x8xf32>
      %c0_51 = arith.constant 0 : index
      %c8_52 = arith.constant 8 : index
      %91 = vector.load %arg9[%c0_51, %c8_52] : memref<8x32xf32, #tpu.memory_space<vmem>>, vector<8x8xf32>
      tpu.vector_store %arg9[%c0_51, %c8_52], %90 {strides = array<i32>} : memref<8x32xf32, #tpu.memory_space<vmem>>, vector<8x8xf32>,
      %c0_53 = arith.constant 0 : index
      %c1_54 = arith.constant 1 : index
      %92 = vector.load %arg7[%c0_53, %c1_54] : memref<8x4xf32, #tpu.memory_space<vmem>>, vector<8x1xf32>
      tpu.vector_store %arg7[%c0_53, %c1_54], %73 {strides = array<i32>} : memref<8x4xf32, #tpu.memory_space<vmem>>, vector<8x1xf32>,
      %c0_55 = arith.constant 0 : index
      %c0_56 = arith.constant 0 : index
      %c16 = arith.constant 16 : index
      %93 = vector.load %arg3[%c0_55, %c0_56, %c16] : memref<1x8x32xf32, #tpu.memory_space<vmem>>, vector<1x8x8xf32>
      %94 = vector.shape_cast %93 : vector<1x8x8xf32> to vector<8x8xf32>
      %cst_57 = arith.constant 0.353553385 : f32
      %95 = vector.broadcast %cst_57 : f32 to vector<8x8xf32>
      %96 = arith.mulf %94, %95 : vector<8x8xf32>
      %97 = arith.truncf %96 : vector<8x8xf32> to vector<8x8xbf16>
      %c0_58 = arith.constant 0 : index
      %c0_59 = arith.constant 0 : index
      %c16_60 = arith.constant 16 : index
      %98 = vector.load %arg4[%c0_58, %c0_59, %c16_60] : memref<1x8x32xf32, #tpu.memory_space<vmem>>, vector<1x8x8xf32>
      %99 = vector.shape_cast %98 : vector<1x8x8xf32> to vector<8x8xf32>
      %100 = arith.truncf %99 : vector<8x8xf32> to vector<8x8xbf16>
      %c0_61 = arith.constant 0 : index
      %c0_62 = arith.constant 0 : index
      %c16_63 = arith.constant 16 : index
      %101 = vector.load %arg5[%c0_61, %c0_62, %c16_63] : memref<1x8x32xf32, #tpu.memory_space<vmem>>, vector<1x8x8xf32>
      %102 = vector.shape_cast %101 : vector<1x8x8xf32> to vector<8x8xf32>
      %103 = arith.truncf %102 : vector<8x8xf32> to vector<8x8xbf16>
      %cst_64 = arith.constant dense<0.000000e+00> : vector<8x8xf32>
      %104 = tpu.matmul %97, %100, %cst_64 {dimension_numbers = #tpu.dot_dimension_numbers<[1], [1], [0], [0], [0, 0, 1, 0], [], []>} : vector<8x8xbf16>, vector<8x8xbf16>, vector<8x8xf32> -> vector<8x8xf32>
      %cst_65 = arith.constant -1.000000e+30 : f32
      %105 = vector.broadcast %cst_65 : f32 to vector<8x8xf32>
      %106 = arith.select %18, %104, %105 : vector<8x8xi1>, vector<8x8xf32>
      %c0_66 = arith.constant 0 : index
      %c2 = arith.constant 2 : index
      %107 = vector.load %arg7[%c0_66, %c2] : memref<8x4xf32, #tpu.memory_space<vmem>>, vector<8x1xf32>
      %cst_67 = arith.constant dense<0xFF800000> : vector<8xf32>
      %108 = vector.multi_reduction <maximumf>, %106, %cst_67 [1] : vector<8x8xf32> to vector<8xf32>
      %109 = vector.shape_cast %108 : vector<8xf32> to vector<8x1xf32>
      %110 = arith.maximumf %107, %109 : vector<8x1xf32>
      %111 = arith.subf %107, %110 : vector<8x1xf32>
      %112 = math.exp %111 : vector<8x1xf32>
      %113 = vector.broadcast %110 : vector<8x1xf32> to vector<8x8xf32>
      %114 = arith.subf %106, %113 : vector<8x8xf32>
      %115 = math.exp %114 : vector<8x8xf32>
      %c0_68 = arith.constant 0 : index
      %c2_69 = arith.constant 2 : index
      %116 = vector.load %arg8[%c0_68, %c2_69] : memref<8x4xf32, #tpu.memory_space<vmem>>, vector<8x1xf32>
      %117 = arith.mulf %112, %116 : vector<8x1xf32>
      %cst_70 = arith.constant dense<0.000000e+00> : vector<8xf32>
      %118 = vector.multi_reduction <add>, %115, %cst_70 [1] : vector<8x8xf32> to vector<8xf32>
      %119 = vector.shape_cast %118 : vector<8xf32> to vector<8x1xf32>
      %120 = arith.addf %117, %119 : vector<8x1xf32>
      %c0_71 = arith.constant 0 : index
      %c2_72 = arith.constant 2 : index
      %121 = vector.load %arg8[%c0_71, %c2_72] : memref<8x4xf32, #tpu.memory_space<vmem>>, vector<8x1xf32>
      tpu.vector_store %arg8[%c0_71, %c2_72], %120 {strides = array<i32>} : memref<8x4xf32, #tpu.memory_space<vmem>>, vector<8x1xf32>,
      %c0_73 = arith.constant 0 : index
      %c16_74 = arith.constant 16 : index
      %122 = vector.load %arg9[%c0_73, %c16_74] : memref<8x32xf32, #tpu.memory_space<vmem>>, vector<8x8xf32>
      %123 = vector.broadcast %112 : vector<8x1xf32> to vector<8x8xf32>
      %124 = arith.mulf %123, %122 : vector<8x8xf32>
      %125 = arith.truncf %115 : vector<8x8xf32> to vector<8x8xbf16>
      %cst_75 = arith.constant dense<0.000000e+00> : vector<8x8xf32>
      %126 = tpu.matmul %125, %103, %cst_75 {dimension_numbers = #tpu.dot_dimension_numbers<[1], [0], [0], [1], [0, 0, 1, 1], [], []>} : vector<8x8xbf16>, vector<8x8xbf16>, vector<8x8xf32> -> vector<8x8xf32>
      %127 = arith.addf %124, %126 : vector<8x8xf32>
      %c0_76 = arith.constant 0 : index
      %c16_77 = arith.constant 16 : index
      %128 = vector.load %arg9[%c0_76, %c16_77] : memref<8x32xf32, #tpu.memory_space<vmem>>, vector<8x8xf32>
      tpu.vector_store %arg9[%c0_76, %c16_77], %127 {strides = array<i32>} : memref<8x32xf32, #tpu.memory_space<vmem>>, vector<8x8xf32>,
      %c0_78 = arith.constant 0 : index
      %c2_79 = arith.constant 2 : index
      %129 = vector.load %arg7[%c0_78, %c2_79] : memref<8x4xf32, #tpu.memory_space<vmem>>, vector<8x1xf32>
      tpu.vector_store %arg7[%c0_78, %c2_79], %110 {strides = array<i32>} : memref<8x4xf32, #tpu.memory_space<vmem>>, vector<8x1xf32>,
      %c0_80 = arith.constant 0 : index
      %c0_81 = arith.constant 0 : index
      %c24 = arith.constant 24 : index
      %130 = vector.load %arg3[%c0_80, %c0_81, %c24] : memref<1x8x32xf32, #tpu.memory_space<vmem>>, vector<1x8x8xf32>
      %131 = vector.shape_cast %130 : vector<1x8x8xf32> to vector<8x8xf32>
      %cst_82 = arith.constant 0.353553385 : f32
      %132 = vector.broadcast %cst_82 : f32 to vector<8x8xf32>
      %133 = arith.mulf %131, %132 : vector<8x8xf32>
      %134 = arith.truncf %133 : vector<8x8xf32> to vector<8x8xbf16>
      %c0_83 = arith.constant 0 : index
      %c0_84 = arith.constant 0 : index
      %c24_85 = arith.constant 24 : index
      %135 = vector.load %arg4[%c0_83, %c0_84, %c24_85] : memref<1x8x32xf32, #tpu.memory_space<vmem>>, vector<1x8x8xf32>
      %136 = vector.shape_cast %135 : vector<1x8x8xf32> to vector<8x8xf32>
      %137 = arith.truncf %136 : vector<8x8xf32> to vector<8x8xbf16>
      %c0_86 = arith.constant 0 : index
      %c0_87 = arith.constant 0 : index
      %c24_88 = arith.constant 24 : index
      %138 = vector.load %arg5[%c0_86, %c0_87, %c24_88] : memref<1x8x32xf32, #tpu.memory_space<vmem>>, vector<1x8x8xf32>
      %139 = vector.shape_cast %138 : vector<1x8x8xf32> to vector<8x8xf32>
      %140 = arith.truncf %139 : vector<8x8xf32> to vector<8x8xbf16>
      %cst_89 = arith.constant dense<0.000000e+00> : vector<8x8xf32>
      %141 = tpu.matmul %134, %137, %cst_89 {dimension_numbers = #tpu.dot_dimension_numbers<[1], [1], [0], [0], [0, 0, 1, 0], [], []>} : vector<8x8xbf16>, vector<8x8xbf16>, vector<8x8xf32> -> vector<8x8xf32>
      %cst_90 = arith.constant -1.000000e+30 : f32
      %142 = vector.broadcast %cst_90 : f32 to vector<8x8xf32>
      %143 = arith.select %18, %141, %142 : vector<8x8xi1>, vector<8x8xf32>
      %c0_91 = arith.constant 0 : index
      %c3 = arith.constant 3 : index
      %144 = vector.load %arg7[%c0_91, %c3] : memref<8x4xf32, #tpu.memory_space<vmem>>, vector<8x1xf32>
      %cst_92 = arith.constant dense<0xFF800000> : vector<8xf32>
      %145 = vector.multi_reduction <maximumf>, %143, %cst_92 [1] : vector<8x8xf32> to vector<8xf32>
      %146 = vector.shape_cast %145 : vector<8xf32> to vector<8x1xf32>
      %147 = arith.maximumf %144, %146 : vector<8x1xf32>
      %148 = arith.subf %144, %147 : vector<8x1xf32>
      %149 = math.exp %148 : vector<8x1xf32>
      %150 = vector.broadcast %147 : vector<8x1xf32> to vector<8x8xf32>
      %151 = arith.subf %143, %150 : vector<8x8xf32>
      %152 = math.exp %151 : vector<8x8xf32>
      %c0_93 = arith.constant 0 : index
      %c3_94 = arith.constant 3 : index
      %153 = vector.load %arg8[%c0_93, %c3_94] : memref<8x4xf32, #tpu.memory_space<vmem>>, vector<8x1xf32>
      %154 = arith.mulf %149, %153 : vector<8x1xf32>
      %cst_95 = arith.constant dense<0.000000e+00> : vector<8xf32>
      %155 = vector.multi_reduction <add>, %152, %cst_95 [1] : vector<8x8xf32> to vector<8xf32>
      %156 = vector.shape_cast %155 : vector<8xf32> to vector<8x1xf32>
      %157 = arith.addf %154, %156 : vector<8x1xf32>
      %c0_96 = arith.constant 0 : index
      %c3_97 = arith.constant 3 : index
      %158 = vector.load %arg8[%c0_96, %c3_97] : memref<8x4xf32, #tpu.memory_space<vmem>>, vector<8x1xf32>
      tpu.vector_store %arg8[%c0_96, %c3_97], %157 {strides = array<i32>} : memref<8x4xf32, #tpu.memory_space<vmem>>, vector<8x1xf32>,
      %c0_98 = arith.constant 0 : index
      %c24_99 = arith.constant 24 : index
      %159 = vector.load %arg9[%c0_98, %c24_99] : memref<8x32xf32, #tpu.memory_space<vmem>>, vector<8x8xf32>
      %160 = vector.broadcast %149 : vector<8x1xf32> to vector<8x8xf32>
      %161 = arith.mulf %160, %159 : vector<8x8xf32>
      %162 = arith.truncf %152 : vector<8x8xf32> to vector<8x8xbf16>
      %cst_100 = arith.constant dense<0.000000e+00> : vector<8x8xf32>
      %163 = tpu.matmul %162, %140, %cst_100 {dimension_numbers = #tpu.dot_dimension_numbers<[1], [0], [0], [1], [0, 0, 1, 1], [], []>} : vector<8x8xbf16>, vector<8x8xbf16>, vector<8x8xf32> -> vector<8x8xf32>
      %164 = arith.addf %161, %163 : vector<8x8xf32>
      %c0_101 = arith.constant 0 : index
      %c24_102 = arith.constant 24 : index
      %165 = vector.load %arg9[%c0_101, %c24_102] : memref<8x32xf32, #tpu.memory_space<vmem>>, vector<8x8xf32>
      tpu.vector_store %arg9[%c0_101, %c24_102], %164 {strides = array<i32>} : memref<8x32xf32, #tpu.memory_space<vmem>>, vector<8x8xf32>,
      %c0_103 = arith.constant 0 : index
      %c3_104 = arith.constant 3 : index
      %166 = vector.load %arg7[%c0_103, %c3_104] : memref<8x4xf32, #tpu.memory_space<vmem>>, vector<8x1xf32>
      tpu.vector_store %arg7[%c0_103, %c3_104], %147 {strides = array<i32>} : memref<8x4xf32, #tpu.memory_space<vmem>>, vector<8x1xf32>,
    } else {
    }
    %c0_i32_3 = arith.constant 0 : i32
    %9 = arith.cmpi eq, %arg2, %c0_i32_3 : i32
    %10 = arith.extui %9 : i1 to i32
    %c0_i32_4 = arith.constant 0 : i32
    %11 = arith.cmpi ne, %10, %c0_i32_4 : i32
    scf.if %11 {
      %c0 = arith.constant 0 : index
      %c0_5 = arith.constant 0 : index
      %12 = vector.load %arg9[%c0, %c0_5] : memref<8x32xf32, #tpu.memory_space<vmem>>, vector<8x8xf32>
      %c0_6 = arith.constant 0 : index
      %c0_7 = arith.constant 0 : index
      %13 = vector.load %arg8[%c0_6, %c0_7] : memref<8x4xf32, #tpu.memory_space<vmem>>, vector<8x1xf32>
      %14 = tpu.reciprocal %13 {approx = true} : vector<8x1xf32> -> vector<8x1xf32>
      %15 = vector.broadcast %14 : vector<8x1xf32> to vector<8x8xf32>
      %16 = arith.mulf %12, %15 : vector<8x8xf32>
      %c0_8 = arith.constant 0 : index
      %c0_9 = arith.constant 0 : index
      %17 = vector.load %arg9[%c0_8, %c0_9] : memref<8x32xf32, #tpu.memory_space<vmem>>, vector<8x8xf32>
      tpu.vector_store %arg9[%c0_8, %c0_9], %16 {strides = array<i32>} : memref<8x32xf32, #tpu.memory_space<vmem>>, vector<8x8xf32>,
      %c0_10 = arith.constant 0 : index
      %c8 = arith.constant 8 : index
      %18 = vector.load %arg9[%c0_10, %c8] : memref<8x32xf32, #tpu.memory_space<vmem>>, vector<8x8xf32>
      %c0_11 = arith.constant 0 : index
      %c1 = arith.constant 1 : index
      %19 = vector.load %arg8[%c0_11, %c1] : memref<8x4xf32, #tpu.memory_space<vmem>>, vector<8x1xf32>
      %20 = tpu.reciprocal %19 {approx = true} : vector<8x1xf32> -> vector<8x1xf32>
      %21 = vector.broadcast %20 : vector<8x1xf32> to vector<8x8xf32>
      %22 = arith.mulf %18, %21 : vector<8x8xf32>
      %c0_12 = arith.constant 0 : index
      %c8_13 = arith.constant 8 : index
      %23 = vector.load %arg9[%c0_12, %c8_13] : memref<8x32xf32, #tpu.memory_space<vmem>>, vector<8x8xf32>
      tpu.vector_store %arg9[%c0_12, %c8_13], %22 {strides = array<i32>} : memref<8x32xf32, #tpu.memory_space<vmem>>, vector<8x8xf32>,
      %c0_14 = arith.constant 0 : index
      %c16 = arith.constant 16 : index
      %24 = vector.load %arg9[%c0_14, %c16] : memref<8x32xf32, #tpu.memory_space<vmem>>, vector<8x8xf32>
      %c0_15 = arith.constant 0 : index
      %c2 = arith.constant 2 : index
      %25 = vector.load %arg8[%c0_15, %c2] : memref<8x4xf32, #tpu.memory_space<vmem>>, vector<8x1xf32>
      %26 = tpu.reciprocal %25 {approx = true} : vector<8x1xf32> -> vector<8x1xf32>
      %27 = vector.broadcast %26 : vector<8x1xf32> to vector<8x8xf32>
      %28 = arith.mulf %24, %27 : vector<8x8xf32>
      %c0_16 = arith.constant 0 : index
      %c16_17 = arith.constant 16 : index
      %29 = vector.load %arg9[%c0_16, %c16_17] : memref<8x32xf32, #tpu.memory_space<vmem>>, vector<8x8xf32>
      tpu.vector_store %arg9[%c0_16, %c16_17], %28 {strides = array<i32>} : memref<8x32xf32, #tpu.memory_space<vmem>>, vector<8x8xf32>,
      %c0_18 = arith.constant 0 : index
      %c24 = arith.constant 24 : index
      %30 = vector.load %arg9[%c0_18, %c24] : memref<8x32xf32, #tpu.memory_space<vmem>>, vector<8x8xf32>
      %c0_19 = arith.constant 0 : index
      %c3 = arith.constant 3 : index
      %31 = vector.load %arg8[%c0_19, %c3] : memref<8x4xf32, #tpu.memory_space<vmem>>, vector<8x1xf32>
      %32 = tpu.reciprocal %31 {approx = true} : vector<8x1xf32> -> vector<8x1xf32>
      %33 = vector.broadcast %32 : vector<8x1xf32> to vector<8x8xf32>
      %34 = arith.mulf %30, %33 : vector<8x8xf32>
      %c0_20 = arith.constant 0 : index
      %c24_21 = arith.constant 24 : index
      %35 = vector.load %arg9[%c0_20, %c24_21] : memref<8x32xf32, #tpu.memory_space<vmem>>, vector<8x8xf32>
      tpu.vector_store %arg9[%c0_20, %c24_21], %34 {strides = array<i32>} : memref<8x32xf32, #tpu.memory_space<vmem>>, vector<8x8xf32>,
      %c0_22 = arith.constant 0 : index
      %c0_23 = arith.constant 0 : index
      %36 = vector.load %arg9[%c0_22, %c0_23] : memref<8x32xf32, #tpu.memory_space<vmem>>, vector<8x32xf32>
      %c0_24 = arith.constant 0 : index
      %c0_25 = arith.constant 0 : index
      %c0_26 = arith.constant 0 : index
      %37 = vector.load %arg6[%c0_24, %c0_25, %c0_26] : memref<1x8x32xf32, #tpu.memory_space<vmem>>, vector<1x8x32xf32>
      %38 = vector.shape_cast %37 : vector<1x8x32xf32> to vector<8x32xf32>
      %39 = vector.shape_cast %36 : vector<8x32xf32> to vector<1x8x32xf32>
      tpu.vector_store %arg6[%c0_24, %c0_25, %c0_26], %39 {strides = array<i32>} : memref<1x8x32xf32, #tpu.memory_space<vmem>>, vector<1x8x32xf32>,
    } else {
    }
    return
  }
  func.func @transform_0(%arg0: i32, %arg1: i32, %arg2: i32) -> (i32, i32, i32) {
    %c0_i32 = arith.constant 0 : i32
    %c0_i32_0 = arith.constant 0 : i32
    return %arg0, %arg1, %c0_i32 : i32, i32, i32
  }
  func.func @transform_1(%arg0: i32, %arg1: i32, %arg2: i32) -> (i32, i32, i32) {
    %c0_i32 = arith.constant 0 : i32
    %c0_i32_0 = arith.constant 0 : i32
    return %arg0, %arg2, %c0_i32 : i32, i32, i32
  }
  func.func @transform_2(%arg0: i32, %arg1: i32, %arg2: i32) -> (i32, i32, i32) {
    %c0_i32 = arith.constant 0 : i32
    %c0_i32_0 = arith.constant 0 : i32
    return %arg0, %arg2, %c0_i32 : i32, i32, i32
  }
  func.func @transform_3(%arg0: i32, %arg1: i32, %arg2: i32) -> (i32, i32, i32) {
    %c0_i32 = arith.constant 0 : i32
    %c0_i32_0 = arith.constant 0 : i32
    return %arg0, %arg1, %c0_i32 : i32, i32, i32
  }
}

</mosaic_0001>

<bundles_post_ra>
// kernel: csa_forward.9
= control target key start
LH: loop header
LB: loop body
LE: loop exit
PB: predicated region body
PF: predicated region fallthrough
CT: control target
= control target key end

     0   :  { %vm20_vm0 = vcmask 261120   ;;  %v157_v3 = vmov 0.0   ;;  %vm158_vm1 = vmmov 0   ;;  %s222_s0 = inlined_call_operand.vmem [shape: f32[16,32], index: 0, kind: input, shape index: {}]   ;;  %s223_s1 = inlined_call_operand.vmem [shape: f32[32,32], index: 1, kind: input, shape index: {}]   ;;  %s224_s2 = inlined_call_operand.vmem [shape: f32[1,32], index: 2, kind: input, shape index: {}]   ;;  %s225_s3 = inlined_call_operand.hbm [shape: f32[16,32], index: 3, kind: output, shape index: {}]  }
   0x1   :  { %v28_v0 = vld [vmem:[%s223_s1] sm:$0xff]  ;;  %v29_v1 = vld [vmem:[%s223_s1 + $0x8] sm:$0xff]  ;;  %v30_v2 = vld [vmem:[%s223_s1 + $0x10] sm:$0xff]  ;;  %120 = vmatprep.subr.bf16.mxu0 %v157_v3  ;;  %124 = vmatprep.mubr.msk.bf16.mxu0 %vm158_vm1, %v157_v3  ;;  %21 = vst.msk [vmem:[#allocation2] sm:$0xff] %vm20_vm0, %v157_v3 }
   0x2   :  { %v32_v4 = vpack.c.bf16 %v29_v1, %v28_v0  ;;  %v31_v5 = vld [vmem:[%s223_s1 + $0x18] sm:$0xff]  ;;  %22 = vst.msk [vmem:[#allocation2 + $0x8] sm:$0xff] %vm20_vm0, %v157_v3 }
   0x3   :  { %8 = vsyncpa [#allocation4], 0  ;;  %v33_v6 = vpack.c.bf16 %v31_v5, %v30_v2  ;;  %v25_v7 = vld [vmem:[%s222_s0] sm:$0xff]  ;;  %v26_v8 = vld [vmem:[%s222_s0 + $0x8] sm:$0xff]  ;;  %s159_s0 = smov [#allocation3]  }
   0x4   :  { %121 = vmatpush3.bf16.msra.mxu0 %v32_v4  ;;  %v27_v9 = vpack.c.bf16 %v26_v8, %v25_v7  ;;  %v116_v18 = vld [vmem:[%s224_s2] ss:$0 sm:$0xff]  ;;  %s104_s25 = sshll.u32 %s159_s0, 4  ;;  %s105_s25 = int_to_ptr.vmem [resolvable:$true] %s104_s25 }
   0x5   :  { %122 = vmatprep.subr.bf16.mxu0 %v157_v3  ;;  %s133_s26 = scalar_lea.vmem %s105_s25, 256  ;;  %p138_p1 = scmp.lt.s32.totalorder %s105_s25, %s105_s25 }
   0x6   :  { %p134_p0 = scmp.ne.s32.totalorder %s105_s25, %s133_s26  ;;  %p139_p2 = scmp.lt.s32.totalorder %s133_s26, %s133_s26 }
   0x8   :  { %123 = vmatpush3.bf16.msra.mxu0 %v33_v6  ;;  %v23_v10 = vld [vmem:[#allocation2] sm:$0xff]  ;;  %p140_p3 = por %p139_p2, %p138_p1 }
   0x9   :  { %v24_v12 = vld [vmem:[#allocation2 + $0x8] sm:$0xff] }
   0xa   :  { %p141_p4 = pnand %p140_p3, %p134_p0 }
   0xb   :  { %125 = vmatmul.mubr.msk.bf16.vlgmr.msra.gmra.mrb[0].mxu0 %vm20_vm0, %v27_v9 }
  0xde   :  { %v72_v11 = vpop.f32.mrb[0].mxu0 }
  0xdf   :  { %v79_v13 = vadd.f32 %v72_v11, %v23_v10  ;;  %v126_v14 = vpop.f32.mrb[1].mxu0 }
  0xe0   :  { %v75_v15 = vpop.f32.mrb[2].mxu0 }
  0xe1   :  { %81 = vst.msk [vmem:[#allocation2] sm:$0xff] %vm20_vm0, %v79_v13  ;;  %v80_v16 = vadd.f32 %v75_v15, %v24_v12  ;;  %v127_v17 = vpop.f32.mrb[3].mxu0 }
  0xe3   :  { %82 = vst.msk [vmem:[#allocation2 + $0x8] sm:$0xff] %vm20_vm0, %v80_v16 }
  0xe8   :  { %v86_v19 = vld [vmem:[#allocation2] sm:$0xff] }
  0xe9   :  { %v95_v20 = vadd.f32 %v116_v18, %v86_v19 }
  0xea   :  { %v87_v21 = vld [vmem:[#allocation2 + $0x8] sm:$0xff] }
  0xeb   :  { %v96_v22 = vadd.f32 %v116_v18, %v87_v21  ;;  %97 = vst.msk [vmem:[#allocation3] sm:$0xff] %vm20_vm0, %v95_v20 }
  0xed   :  { %98 = vst.msk [vmem:[#allocation3 + $0x8] sm:$0xff] %vm20_vm0, %v96_v22 }
  0xee   :  { %144 = shalt.err (!%p141_p4)
}
  0xef   :  { %s145_s28 = scalar_lea.hbm %s225_s3, 256 }
  0xf0   :  { %p146_p5 = scmp.ne.s32.totalorder %s225_s3, %s145_s28  ;;  %p149_p6 = scmp.lt.u32.totalorder %s145_s28, %s225_s3 }
  0xf2   :  { %p151_p7 = pnand %p149_p6, %p146_p5 }
  0xf4   :  { %154 = shalt.err (!%p151_p7)
}
  0xf5   :  { %s160_s6 = smov 128   ;;  %s161_s7 = smov 8  }
  0xf6   :  { %110 = dma.vmem_to_hbm [thread:$0]  %s105_s25, 256, %s225_s3, [#allocation4], %s160_s6, %s160_s6, %s161_s7  }
  0xf7   :  { %155 = dma.done.wait [#allocation4], 256  }
  0xf8   :  { %156 = vsyncadd [#allocation4], 4294967040 }
  0xf9   :  { %114 = vsyncpa [#allocation4], 1 }

// kernel: csa_forward.7
= control target key start
LH: loop header
LB: loop body
LE: loop exit
PB: predicated region body
PF: predicated region fallthrough
CT: control target
= control target key end

     0   :  { %vm19_vm0 = vcmask 261120   ;;  %v117_v0 = vmov 0.0   ;;  %vm118_vm1 = vmmov 0   ;;  %s173_s1 = inlined_call_operand.vmem [shape: f32[32,32], index: 1, kind: input, shape index: {}]   ;;  %s174_s0 = inlined_call_operand.vmem [shape: f32[16,32], index: 0, kind: input, shape index: {}]   ;;  %s175_s2 = inlined_call_operand.vmem [shape: f32[1,32], index: 2, kind: input, shape index: {}]   ;;  %s176_s3 = inlined_call_operand.vmem [shape: f32[16,32], index: 3, kind: output, shape index: {}]  }
   0x1   :  { %107 = vmatprep.subr.bf16.mxu0 %v117_v0  ;;  %v27_v1 = vld [vmem:[%s173_s1] sm:$0xff]  ;;  %v28_v2 = vld [vmem:[%s173_s1 + $0x8] sm:$0xff]  ;;  %v29_v3 = vld [vmem:[%s173_s1 + $0x10] sm:$0xff]  ;;  %111 = vmatprep.mubr.msk.bf16.mxu0 %vm118_vm1, %v117_v0  ;;  %20 = vst.msk [vmem:[#allocation2] sm:$0xff] %vm19_vm0, %v117_v0 }
   0x2   :  { %21 = vst.msk [vmem:[#allocation2 + $0x8] sm:$0xff] %vm19_vm0, %v117_v0  ;;  %v31_v4 = vpack.c.bf16 %v28_v2, %v27_v1  ;;  %v30_v5 = vld [vmem:[%s173_s1 + $0x18] sm:$0xff]  ;;  %v24_v7 = vld [vmem:[%s174_s0] sm:$0xff]  ;;  %v25_v8 = vld [vmem:[%s174_s0 + $0x8] sm:$0xff] }
   0x3   :  { %v32_v6 = vpack.c.bf16 %v30_v5, %v29_v3  ;;  %v26_v9 = vpack.c.bf16 %v25_v8, %v24_v7  ;;  %v103_v18 = vld [vmem:[%s175_s2] ss:$0 sm:$0xff] }
   0x4   :  { %108 = vmatpush3.bf16.msra.mxu0 %v31_v4 }
   0x5   :  { %109 = vmatprep.subr.bf16.mxu0 %v117_v0 }
   0x8   :  { %110 = vmatpush3.bf16.msra.mxu0 %v32_v6  ;;  %v22_v10 = vld [vmem:[#allocation2] sm:$0xff] }
   0x9   :  { %v23_v12 = vld [vmem:[#allocation2 + $0x8] sm:$0xff] }
   0xb   :  { %112 = vmatmul.mubr.msk.bf16.vlgmr.msra.gmra.mrb[0].mxu0 %vm19_vm0, %v26_v9 }
  0xde   :  { %v71_v11 = vpop.f32.mrb[0].mxu0 }
  0xdf   :  { %v78_v13 = vadd.f32 %v71_v11, %v22_v10  ;;  %v113_v14 = vpop.f32.mrb[1].mxu0 }
  0xe0   :  { %v74_v15 = vpop.f32.mrb[2].mxu0 }
  0xe1   :  { %80 = vst.msk [vmem:[#allocation2] sm:$0xff] %vm19_vm0, %v78_v13  ;;  %v79_v16 = vadd.f32 %v74_v15, %v23_v12  ;;  %v114_v17 = vpop.f32.mrb[3].mxu0 }
  0xe3   :  { %81 = vst.msk [vmem:[#allocation2 + $0x8] sm:$0xff] %vm19_vm0, %v79_v16 }
  0xe8   :  { %v85_v19 = vld [vmem:[#allocation2] sm:$0xff] }
  0xe9   :  { %v94_v20 = vadd.f32 %v103_v18, %v85_v19 }
  0xea   :  { %v86_v21 = vld [vmem:[#allocation2 + $0x8] sm:$0xff] }
  0xeb   :  { %96 = vst.msk [vmem:[%s176_s3] sm:$0xff] %vm19_vm0, %v94_v20  ;;  %v95_v22 = vadd.f32 %v103_v18, %v86_v21 }
  0xed   :  { %97 = vst.msk [vmem:[%s176_s3 + $0x8] sm:$0xff] %vm19_vm0, %v95_v22 }

// kernel: csa_forward.8
= control target key start
LH: loop header
LB: loop body
LE: loop exit
PB: predicated region body
PF: predicated region fallthrough
CT: control target
= control target key end

     0   :  { %s1235_s12 = smov 0   ;;  %s1237_s13 = smov 0   ;;  %s1462_s0 = inlined_call_operand.vmem [shape: f32[2,8,32], index: 0, kind: input, shape index: {}]   ;;  %s1463_s1 = inlined_call_operand.vmem [shape: f32[2,8,32], index: 1, kind: input, shape index: {}]   ;;  %s1464_s2 = inlined_call_operand.vmem [shape: f32[2,8,32], index: 2, kind: input, shape index: {}]   ;;  %s1465_s3 = inlined_call_operand.vmem [shape: f32[2,8,32], index: 3, kind: output, shape index: {}]  }
   0x1   :  { %s1239_s14 = smov 0  }
   0x2 LB: > { %s32_s15 = sadd.s32 1, %s1196_s13  ;;  %p1031_p0 = scmp.ge.s32.totalorder %s1200_s14, 1  ;;  %s1200_s14 = sphi %s1239_s14, %s13_s14   ;;  %s1196_s13 = sphi %s1237_s13, %s1467_s13   ;;  %s1192_s12 = sphi %s1235_s12, %s1466_s12  }
   0x3   : > { %p34_p1 = scmp.ge.s32.totalorder %s32_s15, 2  ;;  %p190_p2 = scmp.lt.s32.totalorder %s1200_s14, 3 }
   0x5   : > { %s1469_s15 = smov (%p34_p1, %s32_s15), 0  ;;  %p191_p3 = pnand %p1031_p0, %p190_p2 }
   0x6   : > { %p232_p4 = scmp.lt.s32.totalorder (!%p191_p3), %s1192_s12, 1  ;;  %v1202_v0 = vmov (!%p191_p3), 0.0   ;;  %vm1203_vm0 = vmmov (!%p191_p3), 0   ;;  %vm293_vm1 = vcmask (!%p191_p3), 64512   ;;  %vm265_vm2 = vcmask (!%p191_p3), 31744   ;;  %s1206_s23 = smov (!%p191_p3), 120  }
   0x7   : > { %194 = sbr.rel (%p191_p3) target bundleno = 1450 (0x5aa), region = 32  ;;  %1062 = vmatprep.subr.bf16.mxu0 (!%p191_p3), %v1202_v0  ;;  %1064 = vmatprep.mubr.msk.bf16.mxu0 (!%p191_p3), %vm1203_vm0, %v1202_v0  ;;  %v1204_v7 = vmov (!%p191_p3), -1e+30   ;;  %267 = vst.msk [vmem:[#allocation3] sm:$0xff] (!%p191_p3), %vm265_vm2, %v1202_v0  ;;  %v277_v8 = vlaneseq (!%p191_p3)  ;;  %v1205_v17 = vmov (!%p191_p3), 0   ;;  %s1207_s24 = smov (!%p191_p3), 112  }
   0x8   : > { %1068 = vmatprep.subr.bf16.mxu1 (!%p191_p3), %v1202_v0  ;;  %1070 = vmatprep.mubr.msk.bf16.mxu1 (!%p191_p3), %vm1203_vm0, %v1202_v0  ;;  %266 = vst.msk [vmem:[#allocation2] sm:$0xff] (!%p191_p3), %vm265_vm2, %v1204_v7  ;;  %s1208_s25 = smov (!%p191_p3), 104   ;;  %vm363_vm4 = vcmask (!%p191_p3), 7168   ;;  %vm376_vm5 = vcmask (!%p191_p3), 1043456   ;;  %v1209_v60 = vmov (!%p191_p3), 1   ;;  %v1210_v62 = vmov (!%p191_p3), 2  }
   0x9   : > { %v1275_v9 = vshrl.u32 (!%p191_p3), %v277_v8, 7  ;;  %v1277_v10 = vand.u32 (!%p191_p3), 127, %v277_v8  ;;  %1147 = vset.pattern.permute.xlu0 (!%p191_p3), %v1205_v17  ;;  %1148 = vset.pattern.permute.xlu1 (!%p191_p3), %v1209_v60  ;;  %vm505_vm6 = vcmask (!%p191_p3), 15368   ;;  %vm654_vm7 = vcmask (!%p191_p3), 23568   ;;  %s1212_s29 = smov (!%p191_p3), 8   ;;  %s1213_s30 = smov (!%p191_p3), 16  }
   0xa   : > { %vm803_vm8 = vcmask (!%p191_p3), 31768   ;;  %vm268_vm9 = vcmask (!%p191_p3), 261120   ;;  %s1214_s4 = smov (!%p191_p3), 24   ;;  %vm569_vm10 = vcmask (!%p191_p3), 130112   ;;  %vm718_vm11 = vcmask (!%p191_p3), 195712  }
   0xb   : > { %vm285_vm3 = vcmp.le.s32.totalorder (!%p191_p3), %v1277_v10, %v1275_v9  ;;  %269 = vst.msk [vmem:[#allocation4] sm:$0xff] (!%p191_p3), %vm268_vm9, %v1202_v0  ;;  %vm867_vm12 = vcmask (!%p191_p3), 261312  }
   0xe   : > { %s1471_s12 = smov (!%p232_p4, %s1192_s12), 1 }
   0xf   : > { %s1259_s16 = sshll.u32 %s1471_s12, 3  ;;  %v1292_v18 = vld [vmem:[#allocation2] sm:$0xff] }
  0x10   : > { %s245_s19 = scalar_lea.vmem %s1463_s1, %s1259_s16  ;;  %s238_s22 = scalar_lea.vmem %s1462_s0, %s1259_s16 }
  0x11   : > { %v289_v1 = vld [vmem:[%s245_s19] sm:$0xff]  ;;  %s252_s28 = scalar_lea.vmem %s1464_s2, %s1259_s16  ;;  %s259_s7 = scalar_lea.vmem %s1465_s3, %s1259_s16 }
  0x12   : > { %v290_v2 = vpack.c.bf16 %v289_v1, %v289_v1  ;;  %v286_v3 = vld [vmem:[%s238_s22] sm:$0xff] }
  0x13   : > { %v287_v5 = vmul.f32 0.35355338, %v286_v3  ;;  %v291_v22 = vld [vmem:[%s252_s28] sm:$0xff] }
  0x14   : > { %v298_v4 = vsel %vm293_vm1, %v290_v2, 0  ;;  %434 = vrot.lane.b32.xlu1 %v290_v2, %s1206_s23  ;;  %v1306_v23 = vpack.c.bf16 %v291_v22, %v291_v22 }
  0x15   : > { %1063 = vmatpush3.bf16.xpose.msra.mxu0 %v298_v4  ;;  %v288_v6 = vpack.c.bf16 %v287_v5, %v287_v5  ;;  %v1211_v4 = vmov 3  }
  0x16   : > { %1080 = vmatprep.subr.bf16.mxu0 %v1202_v0  ;;  %v378_v24 = vsel %vm376_vm5, %v1306_v23, 0 }
  0x17   : > { %1069 = vmatpush3.bf16.msra.mxu1 %v378_v24 }
  0x18   : > { %431 = vrot.lane.b32.xlu1 %v288_v6, %s1206_s23  ;;  %1074 = vmatprep.subr.bf16.mxu1 %v1202_v0 }
  0x1c   : > { %1065 = vmatmul.mubr.msk.bf16.vlgmr.msra.gmra.mrb[0].mxu0 %vm293_vm1, %v288_v6  ;;  %583 = vrot.lane.b32.xlu1 %v290_v2, %s1207_s24 }
  0x1d   : > { %1082 = vmatprep.mubr.msk.bf16.mxu0 %vm1203_vm0, %v1202_v0 }
  0x20   : > { %580 = vrot.lane.b32.xlu1 %v288_v6, %s1207_s24 }
  0x24   : > { %732 = vrot.lane.b32.xlu1 %v290_v2, %s1208_s25 }
  0x28   : > { %729 = vrot.lane.b32.xlu1 %v288_v6, %s1208_s25 }
  0x86   : > { %v435_v28 = vpop.permute.xlu1 %434 }
  0x87   : > { %v440_v31 = vsel %vm293_vm1, %v435_v28, 0 }
  0x8a   : > { %v432_v29 = vpop.permute.xlu1 %431 }
  0x8e   : > { %v584_v33 = vpop.permute.xlu1 %583 }
  0x8f   : > { %v589_v35 = vsel %vm293_vm1, %v584_v33, 0 }
  0x92   : > { %v581_v34 = vpop.permute.xlu1 %580 }
  0x96   : > { %v733_v36 = vpop.permute.xlu1 %732 }
  0x97   : > { %v738_v37 = vsel %vm293_vm1, %v733_v36, 0 }
  0x9a   : > { %v730_v38 = vpop.permute.xlu1 %729 }
  0xef   : > { %v334_v11 = vpop.f32.mrb[0].mxu0 }
  0xf0   : > { %v340_v12 = vsel %vm285_vm3, %v334_v11, -1e+30  ;;  %v1066_v13 = vpop.f32.mrb[1].mxu0 }
  0xf1   : > { %v337_v14 = vpop.f32.mrb[2].mxu0  ;;  %v342_v15 = vsel %vm293_vm1, %v340_v12, -inf }
  0xf2   : > { %343 = vmax.xlane.f32.xlu0 %v342_v15  ;;  %v1067_v16 = vpop.f32.mrb[3].mxu0 }
 0x17f   : > { %v344_v19 = vpop.xlane.xlu0 %343 }
 0x180   : > { %v1295_v20 = vmax.f32 %v1292_v18, %v344_v19 }
 0x182   : > { %v346_v21 = vsub.f32 %v1292_v18, %v1295_v20  ;;  %422 = vst.msk [vmem:[#allocation2] sm:$0xff] %vm363_vm4, %v1295_v20  ;;  %351 = vperm.xlu0 %1147, %v1295_v20  }
 0x184   : > { %v347_v14 = vmul.f32 1.442695, %v346_v21 }
 0x186   : > { %1149 = vset.pattern.permute.xlu0 %v1210_v62 }
 0x189   : > { %v1355_v1 = vld [vmem:[#allocation2] sm:$0xff] }
 0x201   : > { %v352_v25 = vpop.permute.xlu0 %351 }
 0x202   : > { %v354_v26 = vsub.f32 %v340_v12, %v352_v25 }
 0x204   : > { %v355_v27 = vmul.f32 1.442695, %v354_v26 }
 0x206   : > { %1160 = vpow2.f32 %v355_v27 }
 0x207   : > { %1162 = vpow2.f32 %v347_v14 }
 0x210   : > { %v1311_v30 = vpop.eup %1160 }
 0x211   : > { %v372_v32 = vpack.c.bf16 %v1311_v30, %v1311_v30  ;;  %v359_v13 = vsel %vm293_vm1, %v1311_v30, 0.0  ;;  %v1163_v15 = vpop.eup %1162 }
 0x213   : > { %1071 = vmatmul.mubr.msk.bf16.vlgmr.msra.gmra.mrb[0].mxu1 %vm293_vm1, %v372_v32 }
 0x214   : > { %1075 = vmatpush3.bf16.xpose.msra.mxu1 %v440_v31  ;;  %1076 = vmatprep.mubr.msk.bf16.mxu1 %vm1203_vm0, %v1202_v0 }
 0x215   : > { %1086 = vmatprep.subr.bf16.mxu1 %v1202_v0 }
 0x21b   : > { %1077 = vmatmul.mubr.msk.bf16.vlgmr.msra.gmra.mrb[4].mxu1 %vm293_vm1, %v432_v29 }
 0x21c   : > { %1087 = vmatpush3.bf16.xpose.msra.mxu1 %v589_v35  ;;  %1088 = vmatprep.mubr.msk.bf16.mxu1 %vm1203_vm0, %v1202_v0 }
 0x21d   : > { %1098 = vmatprep.subr.bf16.mxu1 %v1202_v0 }
 0x223   : > { %1089 = vmatmul.mubr.msk.bf16.vlgmr.msra.gmra.mrb[8].mxu1 %vm293_vm1, %v581_v34 }
 0x224   : > { %1099 = vmatpush3.bf16.xpose.msra.mxu1 %v738_v37  ;;  %1100 = vmatprep.mubr.msk.bf16.mxu1 %vm1203_vm0, %v1202_v0 }
 0x22b   : > { %1101 = vmatmul.mubr.msk.bf16.vlgmr.msra.gmra.mrb[12].mxu1 %vm293_vm1, %v730_v38 }
 0x2e6   : > { %v1330_v39 = vpop.f32.mrb[0].mxu1 }
 0x2e7   : > { %v1072_v40 = vpop.f32.mrb[1].mxu1 }
 0x2e8   : > { %v417_v41 = vpop.f32.mrb[2].mxu1 }
 0x2e9   : > { %v1073_v42 = vpop.f32.mrb[3].mxu1 }
 0x2ee   : > { %v476_v43 = vpop.f32.mrb[4].mxu1 }
 0x2ef   : > { %v1335_v44 = vsel %vm285_vm3, %v476_v43, -1e+30  ;;  %v1078_v45 = vpop.f32.mrb[5].mxu1 }
 0x2f0   : > { %v479_v46 = vpop.f32.mrb[6].mxu1  ;;  %v484_v47 = vsel %vm293_vm1, %v1335_v44, -inf  ;;  %v357_v45 = vld [vmem:[#allocation3] sm:$0xff] }
 0x2f1   : > { %485 = vmax.xlane.f32.xlu1 %v484_v47  ;;  %v1079_v48 = vpop.f32.mrb[7].mxu1  ;;  %v358_v46 = vmul.f32 %v1163_v15, %v357_v45 }
 0x2f6   : > { %v625_v49 = vpop.f32.mrb[8].mxu1 }
 0x2f7   : > { %v1342_v50 = vsel %vm285_vm3, %v625_v49, -1e+30  ;;  %v1090_v51 = vpop.f32.mrb[9].mxu1  ;;  %v365_v49 = vld [vmem:[#allocation4] sm:$0xff] }
 0x2f8   : > { %v628_v52 = vpop.f32.mrb[10].mxu1  ;;  %v633_v53 = vsel %vm293_vm1, %v1342_v50, -inf }
 0x2f9   : > { %634 = vmax.xlane.f32.xlu0 %v633_v53  ;;  %v1091_v54 = vpop.f32.mrb[11].mxu1 }
 0x2fe   : > { %v774_v55 = vpop.f32.mrb[12].mxu1 }
 0x2ff   : > { %v1349_v56 = vsel %vm285_vm3, %v774_v55, -1e+30  ;;  %v1102_v57 = vpop.f32.mrb[13].mxu1 }
 0x300   : > { %v777_v58 = vpop.f32.mrb[14].mxu1  ;;  %v782_v59 = vsel %vm293_vm1, %v1349_v56, -inf }
 0x301   : > { %v1103_v61 = vpop.f32.mrb[15].mxu1  ;;  %783 = vmax.xlane.f32.xlu1 %v782_v59 }
 0x37e   : > { %v486_v63 = vpop.xlane.xlu1 %485 }
 0x37f   : > { %v1358_v2 = vmax.f32 %v1355_v1, %v486_v63 }
 0x381   : > { %v488_v3 = vsub.f32 %v1355_v1, %v1358_v2  ;;  %571 = vst.msk [vmem:[#allocation2] sm:$0xff] %vm505_vm6, %v1358_v2  ;;  %493 = vperm.xlu1 %1148, %v1358_v2  }
 0x383   : > { %v489_v42 = vmul.f32 1.442695, %v488_v3 }
 0x385   : > { %516 = vrot.lane.b32.xlu1 %v1306_v23, %s1206_s23 }
 0x386   : > { %1150 = vset.pattern.permute.xlu1 %v1211_v4  ;;  %v635_v5 = vpop.xlane.xlu0 %634 }
 0x388   : > { %v1368_v6 = vld [vmem:[#allocation2] sm:$0xff] }
 0x389   : > { %v1371_v7 = vmax.f32 %v1368_v6, %v635_v5 }
 0x38b   : > { %v637_v8 = vsub.f32 %v1368_v6, %v1371_v7  ;;  %720 = vst.msk [vmem:[#allocation2] sm:$0xff] %vm654_vm7, %v1371_v7  ;;  %642 = vperm.xlu0 %1149, %v1371_v7  }
 0x38d   : > { %v638_v43 = vmul.f32 1.442695, %v637_v8 }
 0x38e   : > { %v784_v9 = vpop.xlane.xlu1 %783 }
 0x38f   : > { %1152 = vset.pattern.permute.xlu0 %v1209_v60 }
 0x392   : > { %v1379_v10 = vld [vmem:[#allocation2] sm:$0xff] }
 0x393   : > { %v1382_v11 = vmax.f32 %v1379_v10, %v784_v9 }
 0x395   : > { %v786_v12 = vsub.f32 %v1379_v10, %v1382_v11  ;;  %869 = vst.msk [vmem:[#allocation2] sm:$0xff] %vm803_vm8, %v1382_v11  ;;  %791 = vperm.xlu1 %1150, %v1382_v11  }
 0x397   : > { %v787_v57 = vmul.f32 1.442695, %v786_v12 }
 0x399   : > { %665 = vrot.lane.b32.xlu1 %v1306_v23, %s1207_s24 }
 0x39a   : > { %1151 = vset.pattern.permute.xlu1 %v1205_v17 }
 0x39d   : > { %814 = vrot.lane.b32.xlu1 %v1306_v23, %s1208_s25 }
 0x3c1   : > { %360 = vadd.xlane.f32.xlu1 %v359_v13 }
 0x3d2   : > { %368 = vperm.xlu1 %1151, %v1163_v15  }
 0x3d6   : > { %1154 = vset.pattern.permute.xlu1 %v1211_v4 }
 0x400   : > { %v494_v16 = vpop.permute.xlu1 %493 }
 0x401   : > { %v496_v19 = vsub.f32 %v1335_v44, %v494_v16 }
 0x403   : > { %v497_v22 = vmul.f32 1.442695, %v496_v19 }
 0x404   : > { %v517_v23 = vpop.permute.xlu1 %516 }
 0x405   : > { %1164 = vpow2.f32 %v497_v22  ;;  %v522_v24 = vsel %vm376_vm5, %v517_v23, 0 }
 0x406   : > { %1081 = vmatpush3.bf16.msra.mxu0 %v522_v24 }
 0x407   : > { %1092 = vmatprep.subr.bf16.mxu0 %v1202_v0 }
 0x40a   : > { %v643_v18 = vpop.permute.xlu0 %642 }
 0x40b   : > { %v645_v20 = vsub.f32 %v1342_v50, %v643_v18 }
 0x40d   : > { %v646_v21 = vmul.f32 1.442695, %v645_v20 }
 0x40f   : > { %v1165_v25 = vpop.eup %1164  ;;  %1166 = vpow2.f32 %v646_v21 }
 0x410   : > { %v501_v26 = vsel %vm293_vm1, %v1165_v25, 0.0  ;;  %v514_v27 = vpack.c.bf16 %v1165_v25, %v1165_v25 }
 0x411   : > { %502 = vadd.xlane.f32.xlu0 %v501_v26 }
 0x412   : > { %1083 = vmatmul.mubr.msk.bf16.vlgmr.msra.gmra.mrb[4].mxu0 %vm293_vm1, %v514_v27 }
 0x413   : > { %1094 = vmatprep.mubr.msk.bf16.mxu0 %vm1203_vm0, %v1202_v0 }
 0x414   : > { %v792_v28 = vpop.permute.xlu1 %791 }
 0x415   : > { %v794_v29 = vsub.f32 %v1349_v56, %v792_v28 }
 0x417   : > { %v795_v30 = vmul.f32 1.442695, %v794_v29 }
 0x418   : > { %v666_v31 = vpop.permute.xlu1 %665 }
 0x419   : > { %v1167_v32 = vpop.eup %1166  ;;  %1168 = vpow2.f32 %v795_v30  ;;  %v671_v33 = vsel %vm376_vm5, %v666_v31, 0 }
 0x41a   : > { %1093 = vmatpush3.bf16.msra.mxu0 %v671_v33  ;;  %v650_v34 = vsel %vm293_vm1, %v1167_v32, 0.0  ;;  %v663_v35 = vpack.c.bf16 %v1167_v32, %v1167_v32  ;;  %1170 = vpow2.f32 %v489_v42 }
 0x41b   : > { %651 = vadd.xlane.f32.xlu1 %v650_v34  ;;  %1104 = vmatprep.subr.bf16.mxu0 %v1202_v0  ;;  %1172 = vpow2.f32 %v638_v43 }
 0x41c   : > { %v815_v36 = vpop.permute.xlu1 %814  ;;  %1174 = vpow2.f32 %v787_v57 }
 0x41d   : > { %1095 = vmatmul.mubr.msk.bf16.vlgmr.msra.gmra.mrb[8].mxu0 %vm293_vm1, %v663_v35  ;;  %v820_v37 = vsel %vm376_vm5, %v815_v36, 0 }
 0x41e   : > { %1105 = vmatpush3.bf16.msra.mxu0 %v820_v37  ;;  %1106 = vmatprep.mubr.msk.bf16.mxu0 %vm1203_vm0, %v1202_v0 }
 0x423   : > { %v1169_v38 = vpop.eup %1168 }
 0x424   : > { %v799_v40 = vsel %vm293_vm1, %v1169_v38, 0.0  ;;  %v812_v41 = vpack.c.bf16 %v1169_v38, %v1169_v38  ;;  %v1171_v44 = vpop.eup %1170 }
 0x425   : > { %800 = vadd.xlane.f32.xlu0 %v799_v40  ;;  %v1173_v0 = vpop.eup %1172 }
 0x426   : > { %1107 = vmatmul.mubr.msk.bf16.vlgmr.msra.gmra.mrb[12].mxu0 %vm293_vm1, %v812_v41 }
 0x43b   : > { %510 = vperm.xlu0 %1152, %v1171_v44  }
 0x43f   : > { %1153 = vset.pattern.permute.xlu0 %v1210_v62 }
 0x440   : > { %659 = vperm.xlu0 %1153, %v1173_v0  }
 0x444   : > { %1156 = vset.pattern.permute.xlu0 %v1209_v60 }
 0x44e   : > { %v361_v47 = vpop.xlane.xlu1 %360 }
 0x44f   : > { %v362_v48 = vadd.f32 %v361_v47, %v358_v46 }
 0x451   : > { %364 = vst.msk [vmem:[#allocation3] sm:$0xff] %vm363_vm4, %v362_v48 }
 0x452   : > { %v369_v50 = vpop.permute.xlu1 %368 }
 0x453   : > { %v371_v51 = vmul.f32 %v369_v50, %v365_v49 }
 0x455   : > { %v420_v52 = vadd.f32 %v1330_v39, %v371_v51  ;;  %v1175_v39 = vpop.eup %1174 }
 0x457   : > { %421 = vst.msk [vmem:[#allocation4] sm:$0xff] %vm293_vm1, %v420_v52 }
 0x458   : > { %v499_v53 = vld [vmem:[#allocation3] sm:$0xff] }
 0x459   : > { %v500_v54 = vmul.f32 %v1171_v44, %v499_v53 }
 0x45e   : > { %v507_v24 = vld [vmem:[#allocation4] sm:$0xff] }
 0x49e   : > { %v503_v55 = vpop.xlane.xlu0 %502 }
 0x49f   : > { %v504_v56 = vadd.f32 %v503_v55, %v500_v54 }
 0x4a1   : > { %506 = vst.msk [vmem:[#allocation3] sm:$0xff] %vm505_vm6, %v504_v56 }
 0x4a8   : > { %v648_v58 = vld [vmem:[#allocation3] sm:$0xff]  ;;  %v652_v60 = vpop.xlane.xlu1 %651 }
 0x4a9   : > { %v649_v59 = vmul.f32 %v1173_v0, %v648_v58 }
 0x4ab   : > { %v653_v61 = vadd.f32 %v652_v60, %v649_v59 }
 0x4ad   : > { %655 = vst.msk [vmem:[#allocation3] sm:$0xff] %vm654_vm7, %v653_v61 }
 0x4b2   : > { %v801_v2 = vpop.xlane.xlu0 %800 }
 0x4b4   : > { %v797_v63 = vld [vmem:[#allocation3] sm:$0xff] }
 0x4b5   : > { %v798_v1 = vmul.f32 %v1175_v39, %v797_v63 }
 0x4b7   : > { %v802_v3 = vadd.f32 %v801_v2, %v798_v1 }
 0x4b9   : > { %804 = vst.msk [vmem:[#allocation3] sm:$0xff] %vm803_vm8, %v802_v3 }
 0x4ba   : > { %v511_v23 = vpop.permute.xlu0 %510 }
 0x4bb   : > { %v513_v18 = vmul.f32 %v511_v23, %v507_v24 }
 0x4bf   : > { %v660_v21 = vpop.permute.xlu0 %659 }
 0x4c0   : > { %v874_v9 = vld [vmem:[#allocation3] sm:$0xff] }
 0x4c1   : > { %1176 = vrcp.f32 %v874_v9 }
 0x4cb   : > { %v1177_v14 = vpop.eup %1176 }
 0x4e5   : > { %v558_v5 = vpop.f32.mrb[4].mxu0 }
 0x4e6   : > { %565 = vrot.lane.b32.xlu1 %v558_v5, %s1212_s29  ;;  %v1084_v6 = vpop.f32.mrb[5].mxu0 }
 0x4e7   : > { %v561_v7 = vpop.f32.mrb[6].mxu0 }
 0x4e8   : > { %v1085_v8 = vpop.f32.mrb[7].mxu0 }
 0x4f0   : > { %v707_v10 = vpop.f32.mrb[8].mxu0 }
 0x4f1   : > { %714 = vrot.lane.b32.xlu1 %v707_v10, %s1213_s30  ;;  %v1096_v11 = vpop.f32.mrb[9].mxu0 }
 0x4f2   : > { %v710_v12 = vpop.f32.mrb[10].mxu0 }
 0x4f3   : > { %v1097_v13 = vpop.f32.mrb[11].mxu0 }
 0x4f5   : > { %808 = vperm.xlu1 %1154, %v1175_v39  }
 0x4f9   : > { %1155 = vset.pattern.permute.xlu1 %v1205_v17  ;;  %v856_v15 = vpop.f32.mrb[12].mxu0 }
 0x4fa   : > { %878 = vperm.xlu1 %1155, %v1177_v14   ;;  %863 = vrot.lane.b32.xlu0 %v856_v15, %s1214_s4  ;;  %v1108_v16 = vpop.f32.mrb[13].mxu0 }
 0x4fb   : > { %v859_v19 = vpop.f32.mrb[14].mxu0 }
 0x4fc   : > { %v1109_v22 = vpop.f32.mrb[15].mxu0 }
 0x4fe   : > { %1157 = vset.pattern.permute.xlu1 %v1210_v62  ;;  %889 = vperm.xlu0 %1156, %v1177_v14  }
 0x4ff   : > { %900 = vperm.xlu1 %1157, %v1177_v14  }
 0x502   : > { %1159 = vset.pattern.permute.xlu0 %v1211_v4 }
 0x503   : > { %1158 = vset.pattern.permute.xlu1 %v1211_v4 }
 0x504   : > { %911 = vperm.xlu1 %1158, %v1177_v14  }
 0x558   : > { %v566_v17 = vpop.permute.xlu1 %565 }
 0x559   : > { %v568_v20 = vadd.f32 %v566_v17, %v513_v18 }
 0x55b   : > { %570 = vst.msk [vmem:[#allocation4] sm:$0xff] %vm569_vm10, %v568_v20 }
 0x562   : > { %v656_v25 = vld [vmem:[#allocation4] sm:$0xff] }
 0x563   : > { %v662_v26 = vmul.f32 %v660_v21, %v656_v25  ;;  %v715_v27 = vpop.permute.xlu1 %714 }
 0x565   : > { %v717_v62 = vadd.f32 %v715_v27, %v662_v26 }
 0x567   : > { %719 = vst.msk [vmem:[#allocation4] sm:$0xff] %vm718_vm11, %v717_v62 }
 0x56c   : > { %v864_v30 = vpop.permute.xlu0 %863 }
 0x56e   : > { %v805_v28 = vld [vmem:[#allocation4] sm:$0xff] }
 0x574   : > { %v809_v29 = vpop.permute.xlu1 %808 }
 0x575   : > { %v811_v4 = vmul.f32 %v809_v29, %v805_v28 }
 0x577   : > { %v866_v31 = vadd.f32 %v864_v30, %v811_v4 }
 0x579   : > { %868 = vst.msk [vmem:[#allocation4] sm:$0xff] %vm867_vm12, %v866_v31  ;;  %v879_v32 = vpop.permute.xlu1 %878 }
 0x57d   : > { %v890_v36 = vpop.permute.xlu0 %889 }
 0x57e   : > { %v901_v38 = vpop.permute.xlu1 %900 }
 0x580   : > { %v873_v33 = vld [vmem:[#allocation4] sm:$0xff] }
 0x581   : > { %v881_v34 = vmul.f32 %v879_v32, %v873_v33 }
 0x583   : > { %883 = vst.msk [vmem:[#allocation4] sm:$0xff] %vm293_vm1, %v881_v34  ;;  %v912_v42 = vpop.permute.xlu1 %911 }
 0x58a   : > { %v884_v35 = vld [vmem:[#allocation4] sm:$0xff] }
 0x58b   : > { %v892_v37 = vmul.f32 %v890_v36, %v884_v35 }
 0x58d   : > { %894 = vst.msk [vmem:[#allocation4] sm:$0xff] %vm569_vm10, %v892_v37 }
 0x594   : > { %v895_v40 = vld [vmem:[#allocation4] sm:$0xff] }
 0x595   : > { %v903_v41 = vmul.f32 %v901_v38, %v895_v40 }
 0x597   : > { %905 = vst.msk [vmem:[#allocation4] sm:$0xff] %vm718_vm11, %v903_v41 }
 0x59e   : > { %v906_v43 = vld [vmem:[#allocation4] sm:$0xff] }
 0x59f   : > { %v914_v44 = vmul.f32 %v912_v42, %v906_v43 }
 0x5a1   : > { %916 = vst.msk [vmem:[#allocation4] sm:$0xff] %vm867_vm12, %v914_v44 }
 0x5a8   : > { %v917_v0 = vld [vmem:[#allocation4] sm:$0xff] }
 0x5a9   : > { %919 = vst.msk [vmem:[%s259_s7] sm:$0xff] %vm268_vm9, %v917_v0 }
 0x5aa PF: > { %s13_s14 = sadd.s32 1, %s1200_s14   ;;  %s1466_s12 = smov %s1196_s13 }
 0x5ab   : > { %p10_p5 = scmp.ge.s32.totalorder %s13_s14, 4   ;;  %s1467_s13 = smov %s1469_s15 }
 0x5ad   :  { %12 = sbr.rel (!%p10_p5) target bundleno = 2 (0x2), region = 80 }

</bundles_post_ra>
